<compile_context>
chip_gen: v7x
topology: tpu7x:2x2x1
jax: 0.10.0
libtpu: 0.0.40
codegen_flags: <defaults>
</compile_context>

<pallas_src>
import jax
import jax.numpy as jnp
from jax.experimental import pallas as pl
from jax.experimental.pallas import tpu as pltpu


def _shift_w(x, zero_col, tap):
    """Shift a (rows, W, C) tile by one along W, inserting a zero column at the border.

    tap == "left":  out[.., w, :] = x[.., w-1, :]  (dx = 0 tap, zero at w == 0)
    tap == "right": out[.., w, :] = x[.., w+1, :]  (dx = 2 tap, zero at w == W-1)
    Built once per conv stage (replacing the 9 misaligned per-matmul slices of the previous
    version); the sublane-axis concat goes to the XLU and is hidden under the MXU work.
    """
    W = x.shape[1]
    if tap == "left":
        return jnp.concatenate([zero_col, x[:, :W - 1, :]], axis=1)
    return jnp.concatenate([x[:, 1:, :], zero_col], axis=1)


def double_conv_kernel(xt_ref, xm_ref, xb_ref, w1_ref, b1_ref, w2_ref, b2_ref,
                       o_ref, xin_ref, mid_ref):
    """Fused (conv3x3 + folded BN + ReLU) x 2 for one (batch, row-tile) grid step.

    xt_ref:  (1, 2, W, Cin)     2 input rows just above the tile (top halo, border-clamped)
    xm_ref:  (1, TH, W, Cin)    the tile's own input rows
    xb_ref:  (1, 2, W, Cin)     2 input rows just below the tile (bottom halo, clamped)
    w1_ref:  (3, 3*Cin, Cmid)   conv1 weights: BN1 scale folded, dx packed into K, bf16
    b1_ref:  (1, Cmid)          folded BN1 bias (f32)
    w2_ref:  (3, 3*Cmid, Cout)  conv2 weights: BN2 scale folded, dx packed into K, bf16
    b2_ref:  (1, Cout)          folded BN2 bias (f32)
    o_ref:   (1, TH, W, Cout)   output tile
    xin_ref: (TH+4, W, 3*Cin)   bf16 scratch: dx-packed input rows (incl. 2-row halos)
    mid_ref: (TH+2, W, 3*Cmid)  bf16 scratch: dx-packed mid activation (incl. 1-row halo)
    """
    TH, W, cin = xm_ref.shape[1], xm_ref.shape[2], xm_ref.shape[3]
    cmid = w1_ref.shape[2]
    cout = o_ref.shape[3]
    R1 = TH + 2                       # mid rows computed (incl. conv2's 1-row halo)
    cdt = xin_ref.dtype               # bf16 compute dtype for MXU operands

    t = pl.program_id(1)
    nt = pl.num_programs(1)

    # ---- Stage 0: assemble the dx-packed input tile in VMEM (halos zeroed at image border).
    top = jnp.where(t > 0, xt_ref[0, :, :, :], 0.0).astype(cdt)
    bot = jnp.where(t < nt - 1, xb_ref[0, :, :, :], 0.0).astype(cdt)
    center = jnp.concatenate([top, xm_ref[0, :, :, :].astype(cdt), bot], axis=0)  # (TH+4,W,Cin)
    zc = jnp.zeros((TH + 4, 1, cin), cdt)
    xin_ref[...] = jnp.concatenate(
        [_shift_w(center, zc, "left"), center, _shift_w(center, zc, "right")], axis=-1)

    # ---- Stage 1: conv1 + folded BN1 + ReLU -> packed mid activation (never touches HBM).
    acc1 = jnp.zeros((R1 * W, cmid), jnp.float32)
    for dy in range(3):               # 3 matmuls, K = 3*Cin, f32 accumulation
        patch = xin_ref[dy:dy + R1, :, :].reshape(R1 * W, 3 * cin)
        acc1 = acc1 + jnp.dot(patch, w1_ref[dy], preferred_element_type=jnp.float32)
    y1 = jnp.maximum(acc1 + b1_ref[0, :], 0.0).astype(cdt).reshape(R1, W, cmid)

    # conv2's zero padding in H applies to the mid activation at the image borders only.
    row = jax.lax.broadcasted_iota(jnp.int32, (R1, 1, 1), 0)
    border = ((t == 0) & (row == 0)) | ((t == nt - 1) & (row == R1 - 1))
    y1 = jnp.where(border, 0.0, y1)

    zm = jnp.zeros((R1, 1, cmid), cdt)
    mid_ref[...] = jnp.concatenate(
        [_shift_w(y1, zm, "left"), y1, _shift_w(y1, zm, "right")], axis=-1)

    # ---- Stage 2: conv2 + folded BN2 + ReLU -> output tile.
    acc2 = jnp.zeros((TH * W, cout), jnp.float32)
    for dy in range(3):               # 3 matmuls, K = 3*Cmid, f32 accumulation
        patch = mid_ref[dy:dy + TH, :, :].reshape(TH * W, 3 * cmid)
        acc2 = acc2 + jnp.dot(patch, w2_ref[dy], preferred_element_type=jnp.float32)
    y2 = jnp.maximum(acc2 + b2_ref[0, :], 0.0)
    o_ref[0, :, :, :] = y2.reshape(TH, W, cout).astype(o_ref.dtype)


def _vmem_capacity_bytes():
    """Per-core VMEM capacity (128 MiB on v5e/v6e, 64 MiB per-TC on v7x); conservative fallback."""
    try:
        info = pltpu.get_tpu_info()
        cap = getattr(info, "vmem_capacity_bytes", None)
        if cap:
            return int(cap)
    except Exception:
        pass
    return 64 * 1024 * 1024


def _estimate_vmem_bytes(TH, W, cin, cmid, cout):
    """Rough live-VMEM estimate for one grid step: pipelined blocks + scratch + temporaries."""
    f32, bf16 = 4, 2
    r1 = TH + 2
    pipeline = (2 * TH * W * cin * f32                           # input tile (double-buffered)
                + 2 * 2 * (2 * W * cin * f32)                    # two 2-row halo blocks
                + 2 * TH * W * cout * f32                        # output tile (double-buffered)
                + 2 * 3 * 3 * (cin * cmid + cmid * cout) * bf16)  # weights (double-buffered)
    scratch = ((TH + 4) * W * 3 * cin * bf16                     # dx-packed input
               + r1 * W * 3 * cmid * bf16)                       # dx-packed mid activation
    live = (r1 * W * cmid * f32                                  # acc1
            + TH * W * cout * f32                                # acc2
            + r1 * W * 3 * max(cin, cmid) * bf16                 # one dy patch slab
            + 3 * (TH + 4) * W * cin * bf16)                     # stage-0 assembly temporaries
    return pipeline + scratch + live


def _pick_row_tile(H, W, cin, cmid, cout, budget, want_two_tiles):
    """Largest multiple-of-8 divisor of H whose VMEM estimate fits the budget."""
    if H % 8 != 0:
        raise ValueError("H must be a multiple of 8")
    cands = sorted((th for th in range(8, H + 1, 8) if H % th == 0), reverse=True)
    fits = [th for th in cands if _estimate_vmem_bytes(th, W, cin, cmid, cout) <= budget]
    if not fits:
        return 8
    if want_two_tiles:
        multi = [th for th in fits if H // th >= 2]
        if multi:
            return multi[0]
    return fits[0]


def double_conv_fused(x_nhwc, w1p, b1, w2p, b2, *, row_tile=None, vmem_limit_bytes=None):
    """Fused DoubleConv on NHWC input.

    w1p/w2p: (3, 3*Cin, Cmid) / (3, 3*Cmid, Cout) bf16 weights with BN scale folded in and the
    dx taps packed into the contraction dim; b1/b2: (1, Cmid)/(1, Cout) folded f32 biases.
    """
    N, H, W, cin = x_nhwc.shape
    cmid = w1p.shape[2]
    cout = w2p.shape[2]
    assert w1p.shape == (3, 3 * cin, cmid) and w2p.shape == (3, 3 * cmid, cout)
    assert H % 8 == 0 and W % 8 == 0, "H and W must be multiples of 8"

    cap = _vmem_capacity_bytes()
    if vmem_limit_bytes is None:
        # ~100 MiB on the 128 MiB chips (v5e/v6e), ~51 MiB on v7x's 64 MiB per-TC VMEM.
        vmem_limit_bytes = min(int(0.8 * cap), 100 * 1024 * 1024)
    if row_tile is None:
        row_tile = _pick_row_tile(H, W, cin, cmid, cout,
                                  budget=int(0.6 * vmem_limit_bytes),
                                  want_two_tiles=(N == 1))
    TH = row_tile
    assert TH % 8 == 0 and H % TH == 0, "row_tile must be a multiple of 8 dividing H"
    nt = H // TH
    hh = TH // 2          # tile height in 2-row (halo-block) units
    nhh = H // 2          # total number of 2-row blocks in H

    grid_spec = pltpu.PrefetchScalarGridSpec(
        num_scalar_prefetch=0,
        grid=(N, nt),
        in_specs=[
            # 2 rows directly above the tile (top halo; clamped at the image border — the
            # kernel masks the clamped rows to zero).
            pl.BlockSpec((1, 2, W, cin),
                         lambda n, t: (n, jnp.maximum(t * hh - 1, 0), 0, 0)),
            # The tile's own rows.
            pl.BlockSpec((1, TH, W, cin), lambda n, t: (n, t, 0, 0)),
            # 2 rows directly below the tile (bottom halo; clamped at the image border).
            pl.BlockSpec((1, 2, W, cin),
                         lambda n, t: (n, jnp.minimum((t + 1) * hh, nhh - 1), 0, 0)),
            # Weights / folded-BN biases: constant-index resident blocks, reused every step.
            pl.BlockSpec((3, 3 * cin, cmid), lambda n, t: (0, 0, 0)),
            pl.BlockSpec((1, cmid), lambda n, t: (0, 0)),
            pl.BlockSpec((3, 3 * cmid, cout), lambda n, t: (0, 0, 0)),
            pl.BlockSpec((1, cout), lambda n, t: (0, 0)),
        ],
        out_specs=pl.BlockSpec((1, TH, W, cout), lambda n, t: (n, t, 0, 0)),
        scratch_shapes=[
            pltpu.VMEM((TH + 4, W, 3 * cin), jnp.bfloat16),     # dx-packed input tile
            pltpu.VMEM((TH + 2, W, 3 * cmid), jnp.bfloat16),    # dx-packed mid activation
        ],
    )
    return pl.pallas_call(
        double_conv_kernel,
        out_shape=jax.ShapeDtypeStruct((N, H, W, cout), x_nhwc.dtype),
        grid_spec=grid_spec,
        compiler_params=pltpu.CompilerParams(
            # Both axes independent -> megacore (v7x, 2 TCs) can shard even at batch == 1.
            dimension_semantics=("parallel", "parallel"),
            vmem_limit_bytes=int(vmem_limit_bytes),
        ),
    )(x_nhwc, x_nhwc, x_nhwc, w1p, b1, w2p, b2)


def fold_conv_bn_packed(w, gamma, beta, mean, var, eps=1e-5):
    """Fold eval-mode BN into the conv and pack dx into the contraction dim.

    w: (3, 3, Cin, Cout) -> ((3, 3*Cin, Cout) bf16 weights, (1, Cout) f32 bias).
    """
    scale = gamma / jnp.sqrt(var + eps)
    kh, kw, cin, cout = w.shape
    w_p = (w * scale[None, None, None, :]).reshape(kh, kw * cin, cout).astype(jnp.bfloat16)
    b_f = (beta - mean * scale).reshape(1, -1).astype(jnp.float32)
    return w_p, b_f


def double_conv_forward(x_nchw, params, *, row_tile=None):
    """PyTorch-equivalent DoubleConv forward (eval-mode BN). Input/output are NCHW."""
    x = jnp.transpose(x_nchw, (0, 2, 3, 1))      # NCHW -> NHWC (channels on lanes)
    w1p, b1 = fold_conv_bn_packed(params["w1"], params["gamma1"], params["beta1"],
                                  params["mean1"], params["var1"])
    w2p, b2 = fold_conv_bn_packed(params["w2"], params["gamma2"], params["beta2"],
                                  params["mean2"], params["var2"])
    y = double_conv_fused(x, w1p, b1, w2p, b2, row_tile=row_tile)
    return jnp.transpose(y, (0, 3, 1, 2))        # NHWC -> NCHW


def init_params(key, in_channels, out_channels, mid_channels=None):
    if not mid_channels:
        mid_channels = out_channels
    ks = jax.random.split(key, 10)
    # Conv weights stored as (kh, kw, Cin, Cout); PyTorch stores (Cout, Cin, kh, kw).
    return {
        "w1": 0.1 * jax.random.normal(ks[0], (3, 3, in_channels, mid_channels), jnp.float32),
        "gamma1": 1.0 + 0.1 * jax.random.normal(ks[1], (mid_channels,), jnp.float32),
        "beta1": 0.1 * jax.random.normal(ks[2], (mid_channels,), jnp.float32),
        "mean1": 0.05 * jax.random.normal(ks[3], (mid_channels,), jnp.float32),
        "var1": 1.0 + 0.1 * jax.random.uniform(ks[4], (mid_channels,), jnp.float32),
        "w2": 0.1 * jax.random.normal(ks[5], (3, 3, mid_channels, out_channels), jnp.float32),
        "gamma2": 1.0 + 0.1 * jax.random.normal(ks[6], (out_channels,), jnp.float32),
        "beta2": 0.1 * jax.random.normal(ks[7], (out_channels,), jnp.float32),
        "mean2": 0.05 * jax.random.normal(ks[8], (out_channels,), jnp.float32),
        "var2": 1.0 + 0.1 * jax.random.uniform(ks[9], (out_channels,), jnp.float32),
    }


def reference_forward(x_nchw, params):
    """Pure-JAX reference (lax.conv, f32) for correctness checking."""
    def block(x, w, gamma, beta, mean, var):
        w_oihw = jnp.transpose(w, (3, 2, 0, 1))  # (kh,kw,Cin,Cout) -> OIHW
        y = jax.lax.conv_general_dilated(
            x, w_oihw, window_strides=(1, 1), padding="SAME",
            dimension_numbers=("NCHW", "OIHW", "NCHW"))
        scale = gamma / jnp.sqrt(var + 1e-5)
        bias = beta - mean * scale
        y = y * scale[None, :, None, None] + bias[None, :, None, None]
        return jnp.maximum(y, 0.0)

    y = block(x_nchw, params["w1"], params["gamma1"], params["beta1"],
              params["mean1"], params["var1"])
    y = block(y, params["w2"], params["gamma2"], params["beta2"],
              params["mean2"], params["var2"])
    return y


if __name__ == "__main__":
    key = jax.random.PRNGKey(0)
    k_x, k_p = jax.random.split(key)

    batch, in_channels, out_channels, H, W = 2, 4, 8, 16, 16
    x = jax.random.normal(k_x, (batch, in_channels, H, W), jnp.float32)
    params = init_params(k_p, in_channels, out_channels)

    ref = jax.block_until_ready(reference_forward(x, params))

    # Multi-tile path (row_tile=8 -> 2 row tiles per image: exercises the halo exchange).
    out = jax.block_until_ready(double_conv_forward(x, params, row_tile=8))
    assert out.shape == (batch, out_channels, H, W)
    err = float(jnp.max(jnp.abs(out - ref)))
    # bf16 MXU operands (f32 accumulation) -> tolerance looser than a pure-f32 kernel.
    assert jnp.allclose(out, ref, atol=6e-2, rtol=6e-2), (
        f"multi-tile mismatch vs reference: max abs err {err}")

    # Auto-tiled path (single row tile per image: exercises nt == 1 border handling).
    out2 = jax.block_until_ready(double_conv_forward(x, params))
    err2 = float(jnp.max(jnp.abs(out2 - ref)))
    assert jnp.allclose(out2, ref, atol=6e-2, rtol=6e-2), (
        f"auto-tile mismatch vs reference: max abs err {err2}")

    print("KERNEL_OK")
</pallas_src>

<mosaic_0001>
module attributes {stable_mosaic.version = 11 : i64} {
  func.func @double_conv_kernel(%arg0: i32, %arg1: i32, %arg2: memref<1x2x16x4xf32, #tpu.memory_space<vmem>>, %arg3: memref<1x8x16x4xf32, #tpu.memory_space<vmem>>, %arg4: memref<1x2x16x4xf32, #tpu.memory_space<vmem>>, %arg5: memref<3x12x8xbf16, #tpu.memory_space<vmem>>, %arg6: memref<1x8xf32, #tpu.memory_space<vmem>>, %arg7: memref<3x24x8xbf16, #tpu.memory_space<vmem>>, %arg8: memref<1x8xf32, #tpu.memory_space<vmem>>, %arg9: memref<1x8x16x8xf32, #tpu.memory_space<vmem>>, %arg10: memref<12x16x12xbf16, #tpu.memory_space<vmem>>, %arg11: memref<10x16x24xbf16, #tpu.memory_space<vmem>>) attributes {dimension_semantics = [#tpu.dimension_semantics<parallel>, #tpu.dimension_semantics<parallel>], iteration_bounds = array<i64: 2, 2>, scalar_prefetch = 0 : i64, scratch_operands = 2 : i64, tpu.core_type = #tpu.core_type<tc>, window_params = [{transform_indices = @transform_0, window_bounds = array<i64: 1, 2, 16, 4>}, {transform_indices = @transform_1, window_bounds = array<i64: 1, 8, 16, 4>}, {transform_indices = @transform_2, window_bounds = array<i64: 1, 2, 16, 4>}, {pipeline_mode = #tpu.pipeline_mode<synchronous>, transform_indices = @transform_3, window_bounds = array<i64: 3, 12, 8>}, {pipeline_mode = #tpu.pipeline_mode<synchronous>, transform_indices = @transform_4, window_bounds = array<i64: 1, 8>}, {pipeline_mode = #tpu.pipeline_mode<synchronous>, transform_indices = @transform_5, window_bounds = array<i64: 3, 24, 8>}, {pipeline_mode = #tpu.pipeline_mode<synchronous>, transform_indices = @transform_6, window_bounds = array<i64: 1, 8>}, {transform_indices = @transform_7, window_bounds = array<i64: 1, 8, 16, 8>}]} {
    %c0_i32 = arith.constant 0 : i32
    %0 = arith.cmpi sgt, %arg1, %c0_i32 : i32
    %c0 = arith.constant 0 : index
    %c0_0 = arith.constant 0 : index
    %c0_1 = arith.constant 0 : index
    %c0_2 = arith.constant 0 : index
    %1 = vector.load %arg2[%c0, %c0_0, %c0_1, %c0_2] : memref<1x2x16x4xf32, #tpu.memory_space<vmem>>, vector<1x2x16x4xf32>
    %2 = vector.shape_cast %1 : vector<1x2x16x4xf32> to vector<2x16x4xf32>
    %cst = arith.constant 0.000000e+00 : f32
    %3 = vector.broadcast %cst : f32 to vector<2x16x4xf32>
    %4 = arith.select %0, %2, %3 : vector<2x16x4xf32>
    %5 = arith.truncf %4 : vector<2x16x4xf32> to vector<2x16x4xbf16>
    %c1_i32 = arith.constant 1 : i32
    %6 = arith.cmpi slt, %arg1, %c1_i32 : i32
    %c0_3 = arith.constant 0 : index
    %c0_4 = arith.constant 0 : index
    %c0_5 = arith.constant 0 : index
    %c0_6 = arith.constant 0 : index
    %7 = vector.load %arg4[%c0_3, %c0_4, %c0_5, %c0_6] : memref<1x2x16x4xf32, #tpu.memory_space<vmem>>, vector<1x2x16x4xf32>
    %8 = vector.shape_cast %7 : vector<1x2x16x4xf32> to vector<2x16x4xf32>
    %cst_7 = arith.constant 0.000000e+00 : f32
    %9 = vector.broadcast %cst_7 : f32 to vector<2x16x4xf32>
    %10 = arith.select %6, %8, %9 : vector<2x16x4xf32>
    %11 = arith.truncf %10 : vector<2x16x4xf32> to vector<2x16x4xbf16>
    %c0_8 = arith.constant 0 : index
    %c0_9 = arith.constant 0 : index
    %c0_10 = arith.constant 0 : index
    %c0_11 = arith.constant 0 : index
    %12 = vector.load %arg3[%c0_8, %c0_9, %c0_10, %c0_11] : memref<1x8x16x4xf32, #tpu.memory_space<vmem>>, vector<1x8x16x4xf32>
    %13 = vector.shape_cast %12 : vector<1x8x16x4xf32> to vector<8x16x4xf32>
    %14 = arith.truncf %13 : vector<8x16x4xf32> to vector<8x16x4xbf16>
    %15 = tpu.concatenate %5, %14, %11 in 0 : vector<2x16x4xbf16>, vector<8x16x4xbf16>, vector<2x16x4xbf16> -> vector<12x16x4xbf16>
    %cst_12 = arith.constant 0.000000e+00 : bf16
    %16 = vector.broadcast %cst_12 : bf16 to vector<12x1x4xbf16>
    %17 = vector.extract_strided_slice %15 {offsets = [0, 0, 0], sizes = [12, 15, 4], strides = [1, 1, 1]} : vector<12x16x4xbf16> to vector<12x15x4xbf16>
    %18 = tpu.concatenate %16, %17 in 1 : vector<12x1x4xbf16>, vector<12x15x4xbf16> -> vector<12x16x4xbf16>
    %19 = vector.extract_strided_slice %15 {offsets = [0, 1, 0], sizes = [12, 15, 4], strides = [1, 1, 1]} : vector<12x16x4xbf16> to vector<12x15x4xbf16>
    %20 = tpu.concatenate %19, %16 in 1 : vector<12x15x4xbf16>, vector<12x1x4xbf16> -> vector<12x16x4xbf16>
    %21 = tpu.concatenate %18, %15, %20 in 2 : vector<12x16x4xbf16>, vector<12x16x4xbf16>, vector<12x16x4xbf16> -> vector<12x16x12xbf16>
    %c0_13 = arith.constant 0 : index
    %c0_14 = arith.constant 0 : index
    %c0_15 = arith.constant 0 : index
    %22 = vector.load %arg10[%c0_13, %c0_14, %c0_15] : memref<12x16x12xbf16, #tpu.memory_space<vmem>>, vector<12x16x12xbf16>
    tpu.vector_store %arg10[%c0_13, %c0_14, %c0_15], %21 {strides = array<i32>} : memref<12x16x12xbf16, #tpu.memory_space<vmem>>, vector<12x16x12xbf16>,
    %cst_16 = arith.constant 0.000000e+00 : f32
    %23 = vector.broadcast %cst_16 : f32 to vector<160x8xf32>
    %c0_17 = arith.constant 0 : index
    %c0_18 = arith.constant 0 : index
    %c0_19 = arith.constant 0 : index
    %24 = vector.load %arg10[%c0_17, %c0_18, %c0_19] : memref<12x16x12xbf16, #tpu.memory_space<vmem>>, vector<10x16x12xbf16>
    %25 = vector.shape_cast %24 : vector<10x16x12xbf16> to vector<160x12xbf16>
    %c0_20 = arith.constant 0 : index
    %c0_21 = arith.constant 0 : index
    %c0_22 = arith.constant 0 : index
    %26 = vector.load %arg5[%c0_20, %c0_21, %c0_22] : memref<3x12x8xbf16, #tpu.memory_space<vmem>>, vector<1x12x8xbf16>
    %27 = vector.shape_cast %26 : vector<1x12x8xbf16> to vector<12x8xbf16>
    %cst_23 = arith.constant dense<0.000000e+00> : vector<160x8xf32>
    %28 = tpu.matmul %25, %27, %cst_23 {dimension_numbers = #tpu.dot_dimension_numbers<[1], [0], [0], [1], [0, 0, 1, 1], [], []>} : vector<160x12xbf16>, vector<12x8xbf16>, vector<160x8xf32> -> vector<160x8xf32>
    %29 = arith.addf %23, %28 : vector<160x8xf32>
    %c1 = arith.constant 1 : index
    %c0_24 = arith.constant 0 : index
    %c0_25 = arith.constant 0 : index
    %30 = vector.load %arg10[%c1, %c0_24, %c0_25] : memref<12x16x12xbf16, #tpu.memory_space<vmem>>, vector<10x16x12xbf16>
    %31 = vector.shape_cast %30 : vector<10x16x12xbf16> to vector<160x12xbf16>
    %c1_26 = arith.constant 1 : index
    %c0_27 = arith.constant 0 : index
    %c0_28 = arith.constant 0 : index
    %32 = vector.load %arg5[%c1_26, %c0_27, %c0_28] : memref<3x12x8xbf16, #tpu.memory_space<vmem>>, vector<1x12x8xbf16>
    %33 = vector.shape_cast %32 : vector<1x12x8xbf16> to vector<12x8xbf16>
    %cst_29 = arith.constant dense<0.000000e+00> : vector<160x8xf32>
    %34 = tpu.matmul %31, %33, %cst_29 {dimension_numbers = #tpu.dot_dimension_numbers<[1], [0], [0], [1], [0, 0, 1, 1], [], []>} : vector<160x12xbf16>, vector<12x8xbf16>, vector<160x8xf32> -> vector<160x8xf32>
    %35 = arith.addf %29, %34 : vector<160x8xf32>
    %c2 = arith.constant 2 : index
    %c0_30 = arith.constant 0 : index
    %c0_31 = arith.constant 0 : index
    %36 = vector.load %arg10[%c2, %c0_30, %c0_31] : memref<12x16x12xbf16, #tpu.memory_space<vmem>>, vector<10x16x12xbf16>
    %37 = vector.shape_cast %36 : vector<10x16x12xbf16> to vector<160x12xbf16>
    %c2_32 = arith.constant 2 : index
    %c0_33 = arith.constant 0 : index
    %c0_34 = arith.constant 0 : index
    %38 = vector.load %arg5[%c2_32, %c0_33, %c0_34] : memref<3x12x8xbf16, #tpu.memory_space<vmem>>, vector<1x12x8xbf16>
    %39 = vector.shape_cast %38 : vector<1x12x8xbf16> to vector<12x8xbf16>
    %cst_35 = arith.constant dense<0.000000e+00> : vector<160x8xf32>
    %40 = tpu.matmul %37, %39, %cst_35 {dimension_numbers = #tpu.dot_dimension_numbers<[1], [0], [0], [1], [0, 0, 1, 1], [], []>} : vector<160x12xbf16>, vector<12x8xbf16>, vector<160x8xf32> -> vector<160x8xf32>
    %41 = arith.addf %35, %40 : vector<160x8xf32>
    %c0_36 = arith.constant 0 : index
    %c0_37 = arith.constant 0 : index
    %42 = vector.load %arg6[%c0_36, %c0_37] : memref<1x8xf32, #tpu.memory_space<vmem>>, vector<1x8xf32>
    %43 = vector.shape_cast %42 : vector<1x8xf32> to vector<8xf32>
    %44 = vector.shape_cast %43 : vector<8xf32> to vector<1x8xf32>
    %45 = vector.broadcast %44 : vector<1x8xf32> to vector<160x8xf32>
    %46 = arith.addf %41, %45 : vector<160x8xf32>
    %cst_38 = arith.constant 0.000000e+00 : f32
    %47 = vector.broadcast %cst_38 : f32 to vector<160x8xf32>
    %48 = arith.maximumf %46, %47 : vector<160x8xf32>
    %49 = arith.truncf %48 : vector<160x8xf32> to vector<160x8xbf16>
    %50 = vector.shape_cast %49 : vector<160x8xbf16> to vector<10x16x8xbf16>
    %51 = tpu.iota {dimensions = array<i32: 0>} : vector<10x1x1xi32>
    %c0_i32_39 = arith.constant 0 : i32
    %52 = arith.cmpi eq, %arg1, %c0_i32_39 : i32
    %c0_i32_40 = arith.constant 0 : i32
    %53 = vector.broadcast %c0_i32_40 : i32 to vector<10x1x1xi32>
    %54 = arith.cmpi eq, %51, %53 : vector<10x1x1xi32>
    %55 = vector.broadcast %52 : i1 to vector<10x1x1xi1>
    %56 = arith.andi %55, %54 : vector<10x1x1xi1>
    %c1_i32_41 = arith.constant 1 : i32
    %57 = arith.cmpi eq, %arg1, %c1_i32_41 : i32
    %c9_i32 = arith.constant 9 : i32
    %58 = vector.broadcast %c9_i32 : i32 to vector<10x1x1xi32>
    %59 = arith.cmpi eq, %51, %58 : vector<10x1x1xi32>
    %60 = vector.broadcast %57 : i1 to vector<10x1x1xi1>
    %61 = arith.andi %60, %59 : vector<10x1x1xi1>
    %62 = arith.ori %56, %61 : vector<10x1x1xi1>
    %cst_42 = arith.constant 0.000000e+00 : f32
    %63 = arith.truncf %cst_42 : f32 to bf16
    %64 = vector.shape_cast %62 : vector<10x1x1xi1> to vector<10x1x1xi1>
    %65 = vector.broadcast %64 : vector<10x1x1xi1> to vector<10x16x8xi1>
    %66 = vector.broadcast %63 : bf16 to vector<10x16x8xbf16>
    %67 = arith.select %65, %66, %50 : vector<10x16x8xi1>, vector<10x16x8xbf16>
    %cst_43 = arith.constant 0.000000e+00 : bf16
    %68 = vector.broadcast %cst_43 : bf16 to vector<10x1x8xbf16>
    %69 = vector.extract_strided_slice %67 {offsets = [0, 0, 0], sizes = [10, 15, 8], strides = [1, 1, 1]} : vector<10x16x8xbf16> to vector<10x15x8xbf16>
    %70 = tpu.concatenate %68, %69 in 1 : vector<10x1x8xbf16>, vector<10x15x8xbf16> -> vector<10x16x8xbf16>
    %71 = vector.extract_strided_slice %67 {offsets = [0, 1, 0], sizes = [10, 15, 8], strides = [1, 1, 1]} : vector<10x16x8xbf16> to vector<10x15x8xbf16>
    %72 = tpu.concatenate %71, %68 in 1 : vector<10x15x8xbf16>, vector<10x1x8xbf16> -> vector<10x16x8xbf16>
    %73 = tpu.concatenate %70, %67, %72 in 2 : vector<10x16x8xbf16>, vector<10x16x8xbf16>, vector<10x16x8xbf16> -> vector<10x16x24xbf16>
    %c0_44 = arith.constant 0 : index
    %c0_45 = arith.constant 0 : index
    %c0_46 = arith.constant 0 : index
    %74 = vector.load %arg11[%c0_44, %c0_45, %c0_46] : memref<10x16x24xbf16, #tpu.memory_space<vmem>>, vector<10x16x24xbf16>
    tpu.vector_store %arg11[%c0_44, %c0_45, %c0_46], %73 {strides = array<i32>} : memref<10x16x24xbf16, #tpu.memory_space<vmem>>, vector<10x16x24xbf16>,
    %cst_47 = arith.constant 0.000000e+00 : f32
    %75 = vector.broadcast %cst_47 : f32 to vector<128x8xf32>
    %c0_48 = arith.constant 0 : index
    %c0_49 = arith.constant 0 : index
    %c0_50 = arith.constant 0 : index
    %76 = vector.load %arg11[%c0_48, %c0_49, %c0_50] : memref<10x16x24xbf16, #tpu.memory_space<vmem>>, vector<8x16x24xbf16>
    %77 = vector.shape_cast %76 : vector<8x16x24xbf16> to vector<128x24xbf16>
    %c0_51 = arith.constant 0 : index
    %c0_52 = arith.constant 0 : index
    %c0_53 = arith.constant 0 : index
    %78 = vector.load %arg7[%c0_51, %c0_52, %c0_53] : memref<3x24x8xbf16, #tpu.memory_space<vmem>>, vector<1x24x8xbf16>
    %79 = vector.shape_cast %78 : vector<1x24x8xbf16> to vector<24x8xbf16>
    %cst_54 = arith.constant dense<0.000000e+00> : vector<128x8xf32>
    %80 = tpu.matmul %77, %79, %cst_54 {dimension_numbers = #tpu.dot_dimension_numbers<[1], [0], [0], [1], [0, 0, 1, 1], [], []>} : vector<128x24xbf16>, vector<24x8xbf16>, vector<128x8xf32> -> vector<128x8xf32>
    %81 = arith.addf %75, %80 : vector<128x8xf32>
    %c1_55 = arith.constant 1 : index
    %c0_56 = arith.constant 0 : index
    %c0_57 = arith.constant 0 : index
    %82 = vector.load %arg11[%c1_55, %c0_56, %c0_57] : memref<10x16x24xbf16, #tpu.memory_space<vmem>>, vector<8x16x24xbf16>
    %83 = vector.shape_cast %82 : vector<8x16x24xbf16> to vector<128x24xbf16>
    %c1_58 = arith.constant 1 : index
    %c0_59 = arith.constant 0 : index
    %c0_60 = arith.constant 0 : index
    %84 = vector.load %arg7[%c1_58, %c0_59, %c0_60] : memref<3x24x8xbf16, #tpu.memory_space<vmem>>, vector<1x24x8xbf16>
    %85 = vector.shape_cast %84 : vector<1x24x8xbf16> to vector<24x8xbf16>
    %cst_61 = arith.constant dense<0.000000e+00> : vector<128x8xf32>
    %86 = tpu.matmul %83, %85, %cst_61 {dimension_numbers = #tpu.dot_dimension_numbers<[1], [0], [0], [1], [0, 0, 1, 1], [], []>} : vector<128x24xbf16>, vector<24x8xbf16>, vector<128x8xf32> -> vector<128x8xf32>
    %87 = arith.addf %81, %86 : vector<128x8xf32>
    %c2_62 = arith.constant 2 : index
    %c0_63 = arith.constant 0 : index
    %c0_64 = arith.constant 0 : index
    %88 = vector.load %arg11[%c2_62, %c0_63, %c0_64] : memref<10x16x24xbf16, #tpu.memory_space<vmem>>, vector<8x16x24xbf16>
    %89 = vector.shape_cast %88 : vector<8x16x24xbf16> to vector<128x24xbf16>
    %c2_65 = arith.constant 2 : index
    %c0_66 = arith.constant 0 : index
    %c0_67 = arith.constant 0 : index
    %90 = vector.load %arg7[%c2_65, %c0_66, %c0_67] : memref<3x24x8xbf16, #tpu.memory_space<vmem>>, vector<1x24x8xbf16>
    %91 = vector.shape_cast %90 : vector<1x24x8xbf16> to vector<24x8xbf16>
    %cst_68 = arith.constant dense<0.000000e+00> : vector<128x8xf32>
    %92 = tpu.matmul %89, %91, %cst_68 {dimension_numbers = #tpu.dot_dimension_numbers<[1], [0], [0], [1], [0, 0, 1, 1], [], []>} : vector<128x24xbf16>, vector<24x8xbf16>, vector<128x8xf32> -> vector<128x8xf32>
    %93 = arith.addf %87, %92 : vector<128x8xf32>
    %c0_69 = arith.constant 0 : index
    %c0_70 = arith.constant 0 : index
    %94 = vector.load %arg8[%c0_69, %c0_70] : memref<1x8xf32, #tpu.memory_space<vmem>>, vector<1x8xf32>
    %95 = vector.shape_cast %94 : vector<1x8xf32> to vector<8xf32>
    %96 = vector.shape_cast %95 : vector<8xf32> to vector<1x8xf32>
    %97 = vector.broadcast %96 : vector<1x8xf32> to vector<128x8xf32>
    %98 = arith.addf %93, %97 : vector<128x8xf32>
    %cst_71 = arith.constant 0.000000e+00 : f32
    %99 = vector.broadcast %cst_71 : f32 to vector<128x8xf32>
    %100 = arith.maximumf %98, %99 : vector<128x8xf32>
    %101 = vector.shape_cast %100 : vector<128x8xf32> to vector<8x16x8xf32>
    %c0_72 = arith.constant 0 : index
    %c0_73 = arith.constant 0 : index
    %c0_74 = arith.constant 0 : index
    %c0_75 = arith.constant 0 : index
    %102 = vector.load %arg9[%c0_72, %c0_73, %c0_74, %c0_75] : memref<1x8x16x8xf32, #tpu.memory_space<vmem>>, vector<1x8x16x8xf32>
    %103 = vector.shape_cast %102 : vector<1x8x16x8xf32> to vector<8x16x8xf32>
    %104 = vector.shape_cast %101 : vector<8x16x8xf32> to vector<1x8x16x8xf32>
    tpu.vector_store %arg9[%c0_72, %c0_73, %c0_74, %c0_75], %104 {strides = array<i32>} : memref<1x8x16x8xf32, #tpu.memory_space<vmem>>, vector<1x8x16x8xf32>,
    return
  }
  func.func @transform_0(%arg0: i32, %arg1: i32) -> (i32, i32, i32, i32) {
    %c4_i32 = arith.constant 4 : i32
    %0 = arith.muli %arg1, %c4_i32 : i32
    %c1_i32 = arith.constant 1 : i32
    %1 = arith.subi %0, %c1_i32 : i32
    %c0_i32 = arith.constant 0 : i32
    %2 = arith.maxsi %1, %c0_i32 : i32
    %c0_i32_0 = arith.constant 0 : i32
    %c0_i32_1 = arith.constant 0 : i32
    %c0_i32_2 = arith.constant 0 : i32
    return %arg0, %2, %c0_i32_0, %c0_i32_1 : i32, i32, i32, i32
  }
  func.func @transform_1(%arg0: i32, %arg1: i32) -> (i32, i32, i32, i32) {
    %c0_i32 = arith.constant 0 : i32
    %c0_i32_0 = arith.constant 0 : i32
    %c0_i32_1 = arith.constant 0 : i32
    return %arg0, %arg1, %c0_i32, %c0_i32_0 : i32, i32, i32, i32
  }
  func.func @transform_2(%arg0: i32, %arg1: i32) -> (i32, i32, i32, i32) {
    %c1_i32 = arith.constant 1 : i32
    %0 = arith.addi %arg1, %c1_i32 : i32
    %c4_i32 = arith.constant 4 : i32
    %1 = arith.muli %0, %c4_i32 : i32
    %c7_i32 = arith.constant 7 : i32
    %2 = arith.minsi %1, %c7_i32 : i32
    %c0_i32 = arith.constant 0 : i32
    %c0_i32_0 = arith.constant 0 : i32
    %c0_i32_1 = arith.constant 0 : i32
    return %arg0, %2, %c0_i32, %c0_i32_0 : i32, i32, i32, i32
  }
  func.func @transform_3(%arg0: i32, %arg1: i32) -> (i32, i32, i32) {
    %c0_i32 = arith.constant 0 : i32
    %c0_i32_0 = arith.constant 0 : i32
    %c0_i32_1 = arith.constant 0 : i32
    %c0_i32_2 = arith.constant 0 : i32
    return %c0_i32, %c0_i32_0, %c0_i32_1 : i32, i32, i32
  }
  func.func @transform_4(%arg0: i32, %arg1: i32) -> (i32, i32) {
    %c0_i32 = arith.constant 0 : i32
    %c0_i32_0 = arith.constant 0 : i32
    %c0_i32_1 = arith.constant 0 : i32
    return %c0_i32, %c0_i32_0 : i32, i32
  }
  func.func @transform_5(%arg0: i32, %arg1: i32) -> (i32, i32, i32) {
    %c0_i32 = arith.constant 0 : i32
    %c0_i32_0 = arith.constant 0 : i32
    %c0_i32_1 = arith.constant 0 : i32
    %c0_i32_2 = arith.constant 0 : i32
    return %c0_i32, %c0_i32_0, %c0_i32_1 : i32, i32, i32
  }
  func.func @transform_6(%arg0: i32, %arg1: i32) -> (i32, i32) {
    %c0_i32 = arith.constant 0 : i32
    %c0_i32_0 = arith.constant 0 : i32
    %c0_i32_1 = arith.constant 0 : i32
    return %c0_i32, %c0_i32_0 : i32, i32
  }
  func.func @transform_7(%arg0: i32, %arg1: i32) -> (i32, i32, i32, i32) {
    %c0_i32 = arith.constant 0 : i32
    %c0_i32_0 = arith.constant 0 : i32
    %c0_i32_1 = arith.constant 0 : i32
    return %arg0, %arg1, %c0_i32, %c0_i32_0 : i32, i32, i32, i32
  }
}

</mosaic_0001>

<bundles_post_ra>
// kernel: tpu_custom_call.1
= control target key start
LH: loop header
LB: loop body
LE: loop exit
PB: predicated region body
PF: predicated region fallthrough
CT: control target
= control target key end

     0   :  { %s2877_s24 = smov 0   ;;  %s2879_s25 = smov 0   ;;  %s3564_s0 = inlined_call_operand.vmem [shape: f32[2,16,16,4], index: 0, kind: input, shape index: {}]   ;;  %s3565_s1 = inlined_call_operand.vmem [shape: f32[2,16,16,4], index: 1, kind: input, shape index: {}]   ;;  %s3566_s2 = inlined_call_operand.vmem [shape: f32[2,16,16,4], index: 2, kind: input, shape index: {}]   ;;  %s3567_s3 = inlined_call_operand.vmem [shape: bf16[3,12,8], index: 3, kind: input, shape index: {}]   ;;  %s3568_s4 = inlined_call_operand.vmem [shape: f32[1,8], index: 4, kind: input, shape index: {}]   ;;  %s3569_s5 = inlined_call_operand.vmem [shape: bf16[3,24,8], index: 5, kind: input, shape index: {}]   ;;  %s3570_s6 = inlined_call_operand.vmem [shape: f32[1,8], index: 6, kind: input, shape index: {}]   ;;  %s3571_s7 = inlined_call_operand.vmem [shape: f32[2,16,16,8], index: 7, kind: output, shape index: {}]  }
   0x1   :  { %s2881_s26 = smov 0   ;;  %s2883_s27 = smov 0  }
   0x2   :  { %s2885_s28 = smov 0  }
   0x3 LB: > { %s26_s29 = sadd.s32 1, %s2824_s26  ;;  %s29_s30 = sadd.s32 1, %s2828_s27  ;;  %s2832_s28 = sphi %s2885_s28, %s17_s28   ;;  %s2828_s27 = sphi %s2883_s27, %s3580_s27   ;;  %s2824_s26 = sphi %s2881_s26, %s3579_s26   ;;  %s2820_s25 = sphi %s2879_s25, %s3578_s25   ;;  %s2816_s24 = sphi %s2877_s24, %s3577_s24  }
   0x4   : > { %p27_p0 = scmp.ge.s32.totalorder %s26_s29, 2  ;;  %p2345_p1 = scmp.ge.s32.totalorder %s2832_s28, 1 }
   0x5   : > { %p327_p2 = scmp.lt.s32.totalorder %s2832_s28, 5 }
   0x6   : > { %s3582_s29 = smov (%p27_p0, %s26_s29), 0  ;;  %s3584_s30 = smov (!%p27_p0, %s29_s30), %s2828_s27 }
   0x7   : > { %p328_p3 = pnand %p2345_p1, %p327_p2  ;;  %p31_p4 = scmp.ge.s32.totalorder %s3584_s30, 2 }
   0x8   : > { %s2346_s8 = sshll.u32 (!%p328_p3), %s2816_s24, 2  ;;  %p402_p5 = scmp.lt.s32.totalorder (!%p328_p3), %s2820_s25, 1  ;;  %vm657_vm0 = vcmask (!%p328_p3), 1047552   ;;  %vm658_vm1 = vsmask.f32 (!%p328_p3), 7424  ;;  %vm892_vm3 = vcmask (!%p328_p3), 1045504  }
   0x9   : > { %s3586_s30 = smov (%p31_p4, %s3584_s30), 0  ;;  %331 = sbr.rel (%p328_p3) target bundleno = 907 (0x38b), region = 48 }
   0xa   : > { %s2347_s9 = sadd.s32 (!%p328_p3), 4294967295, %s2346_s8  ;;  %s2352_s10 = sshll.u32 (!%p328_p3), %s2816_s24, 3  ;;  %vm2975_vm2 = vmand (!%p328_p3), %vm657_vm0, %vm658_vm1  ;;  %v2785_v50 = vld [vmem:[%s3567_s3 + $0x8] sm:$0x3f] (!%p328_p3)   ;;  %v3026_v62 = vld [vmem:[%s3567_s3] sm:$0x3f] (!%p328_p3)  }
   0xb   : > { %p399_p6 = scmp.gt.s32.totalorder (!%p328_p3), %s2347_s9, 0  ;;  %p419_p7 = scmp.lt.s32.totalorder (!%p328_p3), %s2352_s10, 15  ;;  %2711 = vmatprep.subr.msk.bf16.mxu0 (!%p328_p3), %vm892_vm3, %v2785_v50  ;;  %2712 = vmatprep.subr.msk.bf16.mxu1 (!%p328_p3), %vm892_vm3, %v2785_v50  ;;  %vm606_vm4 = vcmask (!%p328_p3), 1040384   ;;  %vm607_vm5 = vsmask.f32 (!%p328_p3), 256  ;;  %vm744_vm7 = vcmask (!%p328_p3), 31744  }
   0xc   : > { %p458_p9 = scmp.gt.s32.totalorder (!%p328_p3), %s2816_s24, 0  ;;  %s2447_s22 = sadd.s32 (!%p328_p3), 4, %s2346_s8  ;;  %vm3120_vm6 = vmand (!%p328_p3), %vm606_vm4, %vm607_vm5  ;;  %vm781_vm8 = vcmask (!%p328_p3), 64512   ;;  %vm818_vm9 = vcmask (!%p328_p3), 97280   ;;  %vm1743_vm11 = vcmask (!%p328_p3), 1043456   ;;  %vm1644_vm13 = vcmask (!%p328_p3), 130048  }
   0xd   : > { %p429_p10 = scmp.lt.s32.totalorder (!%p328_p3), %s2447_s22, 7  ;;  %p472_p11 = scmp.lt.s32.totalorder (!%p328_p3), %s2816_s24, 1  ;;  %vm1675_vm14 = vcmask (!%p328_p3), 195584  }
   0xe   : > { %s2834_s8 = smov (!%p328_p3), 4   ;;  %p1402_p13 = scmp.eq.s32.totalorder (!%p328_p3), %s2816_s24, 0 }
   0xf   : > { %p1406_p0 = scmp.eq.s32.totalorder (!%p328_p3), %s2816_s24, 1 }
  0x10   : > { %s3588_s25 = smov (!%p402_p5, %s2820_s25), 1  ;;  %s3590_s9 = smov (!%p399_p6, %s2347_s9), 0 }
  0x11   : > { %s2348_s11 = sshll.u32 %s3590_s9, 1  ;;  %s2911_s12 = sshll.u32 %s3588_s25, 5 }
  0x12   : > { %p404_p8 = scmp.lt.s32.totalorder %s2348_s11, 15  ;;  %s3592_s10 = smov (!%p419_p7, %s2352_s10), 15 }
  0x13   : > { %s2353_s13 = sshll.u32 %s3592_s10, 1  ;;  %s3596_s22 = smov (!%p429_p10, %s2447_s22), 7 }
  0x14   : > { %s3594_s11 = smov (!%p404_p8, %s2348_s11), 15  ;;  %s2915_s15 = sadd.s32 %s2353_s13, %s2911_s12 }
  0x15   : > { %s2349_s14 = sshll.u32 %s3594_s11, 1  ;;  %s2355_s17 = sshll.u32 %s2915_s15, 3 }
  0x16   : > { %s408_s16 = sadd.s32 %s2911_s12, %s2349_s14  ;;  %s2924_s20 = scalar_lea.vmem %s3565_s1, %s2355_s17 }
  0x17   : > { %s2351_s21 = sshll.u32 %s408_s16, 3  ;;  %v486_v0 = vld [vmem:[%s2924_s20] sm:$0xff]  ;;  %v487_v1 = vld [vmem:[%s2924_s20 + $0x8] sm:$0xff]  ;;  %v488_v2 = vld [vmem:[%s2924_s20 + $0x10] sm:$0xff]  ;;  %s2357_s11 = sshll.u32 %s3596_s22, 1 }
  0x18   : > { %v489_v3 = vld [vmem:[%s2924_s20 + $0x18] sm:$0xff]  ;;  %v2930_v4 = vpack.c.bf16 %v487_v1, %v486_v0  ;;  %s2935_s9 = scalar_lea.vmem %s3564_s0, %s2351_s21  ;;  %v490_v7 = vld [vmem:[%s2924_s20 + $0x20] sm:$0xff]  ;;  %v491_v8 = vld [vmem:[%s2924_s20 + $0x28] sm:$0xff]  ;;  %p2968_p12 = scmp.lt.s32.totalorder %s2357_s11, 15 }
  0x19   : > { %v2937_v5 = vpack.c.bf16 %v489_v3, %v488_v2  ;;  %s2941_s10 = scalar_select %p458_p9, 255, 0  ;;  %v492_v10 = vld [vmem:[%s2924_s20 + $0x30] sm:$0xff]  ;;  %v493_v11 = vld [vmem:[%s2924_s20 + $0x38] sm:$0xff]  ;;  %v2955_v15 = vpack.c.bf16 %v491_v8, %v490_v7  ;;  %v494_v23 = vld [vmem:[%s2924_s20 + $0x40] sm:$0xff]  ;;  %v894_v3 = vsel %vm892_vm3, %v2785_v50, 0 }
  0x1a   : > { %v528_v6 = vshll.u32 %v2930_v4, 16  ;;  %v525_v16 = vshrl.u32 %v2930_v4, 16  ;;  %v2961_v18 = vpack.c.bf16 %v493_v11, %v492_v10  ;;  %v495_v24 = vld [vmem:[%s2924_s20 + $0x48] sm:$0xff]  ;;  %v496_v27 = vld [vmem:[%s2924_s20 + $0x50] sm:$0xff]  ;;  %v497_v28 = vld [vmem:[%s2924_s20 + $0x58] sm:$0xff]  ;;  %s3598_s11 = smov (!%p2968_p12, %s2357_s11), 15  ;;  %2512 = vmatpush3.bf16.msra.mxu0 %v894_v3  ;;  %2638 = vmatpush3.bf16.msra.mxu1 %v894_v3 }
  0x1b   : > { %v2763_v9 = vld [vmem:[%s2935_s9 + $0x10] sm:%s2941_s10]  ;;  %v2766_v12 = vld [vmem:[%s2935_s9 + $0x18] sm:%s2941_s10]  ;;  %v535_v13 = vshll.u32 %v2937_v5, 16  ;;  %v532_v21 = vshrl.u32 %v2937_v5, 16  ;;  %v542_v26 = vshll.u32 %v2955_v15, 16  ;;  %v539_v32 = vshrl.u32 %v2955_v15, 16  ;;  %2713 = vmatprep.subr.msk.bf16.mxu0 %vm892_vm3, %v3026_v62 }
  0x1c   : > { %v471_v14 = vpack.c.bf16 %v2766_v12, %v2763_v9  ;;  %v625_v17 = vrot.slane %v528_v6, 1  ;;  %v527_v30 = vrot.slane %v525_v16, 7  ;;  %v549_v33 = vshll.u32 %v2961_v18, 16  ;;  %v498_v41 = vld [vmem:[%s2924_s20 + $0x60] sm:$0xff]  ;;  %v499_v42 = vld [vmem:[%s2924_s20 + $0x68] sm:$0xff]  ;;  %s2835_s14 = smov 8  }
  0x1d   : > { %v627_v22 = vrot.slane %v535_v13, 1  ;;  %v2983_v36 = vpack.c.bf16 %v495_v24, %v494_v23  ;;  %v534_v37 = vrot.slane %v532_v21, 7  ;;  %v546_v39 = vshrl.u32 %v2961_v18, 16  ;;  %s2358_s19 = sshll.u32 %s3598_s11, 1  ;;  %v2772_v7 = vld [vmem:[%s2935_s9 + $0x8] sm:%s2941_s10]  ;;  %s2836_s22 = smov 16  }
  0x1e   : > { %686 = vrot.lane.b32.xlu0 %v471_v14, %s2834_s8  ;;  %v518_v19 = vshrl.u32 %v471_v14, 16  ;;  %v521_v20 = vshll.u32 %v471_v14, 16  ;;  %v626_v31 = vor.u32 %v625_v17, %v525_v16  ;;  %v2986_v40 = vpack.c.bf16 %v497_v28, %v496_v27  ;;  %s438_s23 = sadd.s32 %s2358_s19, %s2911_s12 }
  0x1f   : > { %v628_v38 = vor.u32 %v627_v22, %v532_v21  ;;  %v541_v44 = vrot.slane %v539_v32, 7  ;;  %v629_v45 = vrot.slane %v542_v26, 1  ;;  %v553_v46 = vshrl.u32 %v2983_v36, 16  ;;  %s2360_s12 = sshll.u32 %s438_s23, 3  ;;  %v501_v21 = vld [vmem:[%s2924_s20 + $0x78] sm:$0xff] }
  0x20   : > { %v623_v25 = vrot.slane %v521_v20, 1  ;;  %v520_v35 = vrot.slane %v518_v19, 7  ;;  %v548_v47 = vrot.slane %v546_v39, 7  ;;  %v631_v48 = vrot.slane %v549_v33, 1  ;;  %s2774_s25 = scalar_select %p472_p11, 255, 0 }
  0x21   : > { %v560_v49 = vshrl.u32 %v2986_v40, 16  ;;  %v662_v51 = vsel %vm2975_vm2, %v626_v31, 0  ;;  %v555_v52 = vrot.slane %v553_v46, 7  ;;  %v3006_v53 = vpack.c.bf16 %v499_v42, %v498_v41  ;;  %s440_s11 = scalar_lea.vmem %s3566_s2, %s2360_s12 }
  0x22   : > { %688 = vrot.lane.b32.xlu0 %v2930_v4, %s2834_s8  ;;  %v624_v34 = vor.u32 %v623_v25, %v518_v19  ;;  %v3008_v54 = vor.u32 %v521_v20, %v520_v35  ;;  %v663_v55 = vsel %vm2975_vm2, %v628_v38, 0  ;;  %v3014_v57 = vor.u32 %v528_v6, %v527_v30  ;;  %v2769_v6 = vld [vmem:[%s2935_s9] sm:%s2941_s10]  ;;  %v500_v20 = vld [vmem:[%s2924_s20 + $0x70] sm:$0xff]  ;;  %s1403_s18 = scalar_select %p1402_p13, 1, 0 }
  0x23   : > { %v562_v56 = vrot.slane %v560_v49, 7  ;;  %v3016_v58 = vor.u32 %v535_v13, %v534_v37  ;;  %v556_v59 = vshll.u32 %v2983_v36, 16  ;;  %v567_v60 = vshrl.u32 %v3006_v53, 16  ;;  %v2775_v23 = vld [vmem:[%s440_s11] sm:%s2774_s25]  ;;  %v2778_v24 = vld [vmem:[%s440_s11 + $0x8] sm:%s2774_s25] }
  0x24   : > { %v661_v43 = vsel %vm2975_vm2, %v624_v34, 0  ;;  %v3021_v61 = vor.u32 %v542_v26, %v541_v44  ;;  %v563_v63 = vshll.u32 %v2986_v40, 16  ;;  %v3031_v0 = vor.u32 %v549_v33, %v548_v47  ;;  %v2784_v37 = vld [vmem:[%s440_s11 + $0x18] sm:%s2774_s25]  ;;  %s1407_s10 = scalar_select %p1406_p0, 1, 0 }
  0x25   : > { %722 = vrot.lane.b32.xlu1 %v661_v43, %s2835_s14  ;;  %v630_v1 = vor.u32 %v629_v45, %v539_v32  ;;  %v569_v2 = vrot.slane %v567_v60, 7  ;;  %v3035_v4 = vor.u32 %v556_v59, %v555_v52  ;;  %v570_v9 = vshll.u32 %v3006_v53, 16 }
  0x26   : > { %690 = vrot.lane.b32.xlu0 %v2937_v5, %s2834_s8  ;;  %v632_v5 = vor.u32 %v631_v48, %v546_v39  ;;  %v3043_v8 = vor.u32 %v563_v63, %v562_v56  ;;  %v633_v11 = vrot.slane %v556_v59, 1  ;;  %v470_v12 = vpack.c.bf16 %v2772_v7, %v2769_v6 }
  0x27   : > { %v664_v10 = vsel %vm2975_vm2, %v630_v1, 0  ;;  %v3054_v13 = vor.u32 %v570_v9, %v569_v2  ;;  %v635_v16 = vrot.slane %v563_v63, 1  ;;  %v637_v26 = vrot.slane %v570_v9, 1 }
  0x28   : > { %v665_v14 = vsel %vm2975_vm2, %v632_v5, 0  ;;  %v634_v17 = vor.u32 %v633_v11, %v553_v46  ;;  %v514_v22 = vshll.u32 %v470_v12, 16  ;;  %v509_v27 = vpack.c.bf16 %v501_v21, %v500_v20 }
  0x29   : > { %724 = vrot.lane.b32.xlu1 %v662_v51, %s2835_s14  ;;  %v636_v19 = vor.u32 %v635_v16, %v560_v49  ;;  %v3077_v31 = vpack.c.bf16 %v2778_v24, %v2775_v23  ;;  %v638_v32 = vor.u32 %v637_v26, %v567_v60  ;;  %v610_v1 = vsel %vm3120_vm6, 0, %v3008_v54 }
  0x2a   : > { %726 = vrot.lane.b32.xlu0 %v663_v55, %s2835_s14  ;;  %v666_v25 = vsel %vm2975_vm2, %v634_v17, 0  ;;  %v621_v33 = vrot.slane %v514_v22, 1  ;;  %v577_v34 = vshll.u32 %v509_v27, 16  ;;  %v574_v38 = vshrl.u32 %v509_v27, 16 }
  0x2b   : > { %v667_v30 = vsel %vm2975_vm2, %v636_v19, 0  ;;  %v584_v35 = vshll.u32 %v3077_v31, 16  ;;  %v668_v39 = vsel %vm2975_vm2, %v638_v32, 0  ;;  %v581_v43 = vshrl.u32 %v3077_v31, 16 }
  0x2c   : > { %v639_v41 = vrot.slane %v577_v34, 1  ;;  %v576_v56 = vrot.slane %v574_v38, 7  ;;  %v611_v5 = vsel %vm3120_vm6, 0, %v3014_v57  ;;  %v612_v7 = vsel %vm3120_vm6, 0, %v3016_v58 }
  0x2d   : > { %692 = vrot.lane.b32.xlu1 %v2955_v15, %s2834_s8  ;;  %v511_v15 = vshrl.u32 %v470_v12, 16  ;;  %v641_v44 = vrot.slane %v584_v35, 1  ;;  %v613_v17 = vsel %vm3120_vm6, 0, %v3021_v61  ;;  %v1045_v23 = vsel %vm892_vm3, %v3026_v62, 0 }
  0x2e   : > { %694 = vrot.lane.b32.xlu0 %v2961_v18, %s2834_s8  ;;  %v640_v46 = vor.u32 %v639_v41, %v574_v38  ;;  %v3118_v59 = vor.u32 %v577_v34, %v576_v56  ;;  %v615_v32 = vsel %vm3120_vm6, 0, %v3035_v4  ;;  %v583_v4 = vrot.slane %v581_v43, 7 }
  0x2f   : > { %v513_v18 = vrot.slane %v511_v15, 7  ;;  %v642_v48 = vor.u32 %v641_v44, %v581_v43 }
  0x30   : > { %v669_v49 = vsel %vm2975_vm2, %v640_v46, 0 }
  0x31   : > { %728 = vrot.lane.b32.xlu1 %v664_v10, %s2835_s14  ;;  %v3073_v28 = vor.u32 %v514_v22, %v513_v18  ;;  %v670_v52 = vsel %vm2975_vm2, %v642_v48, 0 }
  0x32   : > { %730 = vrot.lane.b32.xlu0 %v665_v14, %s2835_s14 }
  0x33   : > { %v609_v48 = vsel %vm3120_vm6, 0, %v3073_v28 }
  0x35   : > { %696 = vrot.lane.b32.xlu1 %v2983_v36, %s2834_s8  ;;  %v2781_v36 = vld [vmem:[%s440_s11 + $0x10] sm:%s2774_s25] }
  0x36   : > { %698 = vrot.lane.b32.xlu0 %v2986_v40, %s2834_s8  ;;  %v622_v40 = vor.u32 %v621_v33, %v511_v15  ;;  %v3087_v42 = vpack.c.bf16 %v2784_v37, %v2781_v36  ;;  %v614_v15 = vsel %vm3120_vm6, 0, %v3031_v0  ;;  %v3159_v0 = vld [vmem:[%s3567_s3 + $0x10] sm:$0x3f]  }
  0x38   : > { %v660_v45 = vsel %vm2975_vm2, %v622_v40, 0  ;;  %v591_v47 = vshll.u32 %v3087_v42, 16  ;;  %v588_v50 = vshrl.u32 %v3087_v42, 16 }
  0x39   : > { %732 = vrot.lane.b32.xlu1 %v666_v25, %s2835_s14 }
  0x3a   : > { %734 = vrot.lane.b32.xlu0 %v667_v30, %s2835_s14  ;;  %v643_v51 = vrot.slane %v591_v47, 1  ;;  %v616_v30 = vsel %vm3120_vm6, 0, %v3043_v8  ;;  %v590_v28 = vrot.slane %v588_v50, 7 }
  0x3d   : > { %700 = vrot.lane.b32.xlu1 %v3006_v53, %s2834_s8  ;;  %v644_v53 = vor.u32 %v643_v51, %v588_v50  ;;  %v593_v50 = vor.u32 %v591_v47, %v590_v28  ;;  %v1210_v47 = vsel %vm892_vm3, %v3159_v0, 0 }
  0x3e   : > { %684 = vrot.lane.b32.xlu0 %v470_v12, %s2834_s8 }
  0x3f   : > { %v671_v55 = vsel %vm2975_vm2, %v644_v53, 0 }
  0x41   : > { %736 = vrot.lane.b32.xlu1 %v668_v39, %s2835_s14 }
  0x42   : > { %702 = vrot.lane.b32.xlu0 %v509_v27, %s2834_s8 }
  0x45   : > { %720 = vrot.lane.b32.xlu1 %v660_v45, %s2835_s14  ;;  %v617_v45 = vsel %vm3120_vm6, 0, %v3054_v13 }
  0x46   : > { %704 = vrot.lane.b32.xlu0 %v3077_v31, %s2834_s8  ;;  %v618_v31 = vsel %vm3120_vm6, 0, %v3118_v59 }
  0x49   : > { %738 = vrot.lane.b32.xlu1 %v669_v49, %s2835_s14 }
  0x4a   : > { %740 = vrot.lane.b32.xlu0 %v670_v52, %s2835_s14  ;;  %v586_v52 = vor.u32 %v584_v35, %v583_v4 }
  0x4d   : > { %706 = vrot.lane.b32.xlu1 %v3087_v42, %s2834_s8 }
  0x51   : > { %742 = vrot.lane.b32.xlu1 %v671_v55, %s2835_s14 }
  0x90   : > { %v687_v63 = vpop.permute.xlu0 %686 }
  0x91   : > { %v750_v3 = vsel %vm744_vm7, %v610_v1, %v687_v63  ;;  %v619_v63 = vsel %vm3120_vm6, 0, %v586_v52 }
  0x94   : > { %v689_v2 = vpop.permute.xlu0 %688 }
  0x95   : > { %v753_v11 = vsel %vm744_vm7, %v611_v5, %v689_v2 }
  0x97   : > { %v723_v6 = vpop.permute.xlu1 %722 }
  0x98   : > { %v786_v9 = vsel %vm781_vm8, %v750_v3, %v723_v6  ;;  %v691_v10 = vpop.permute.xlu0 %690 }
  0x99   : > { %820 = vst.msk [vmem:[#allocation2 + $0x8] sm:$0xff] %vm818_vm9, %v786_v9  ;;  %v756_v54 = vsel %vm744_vm7, %v612_v7, %v691_v10 }
  0x9b   : > { %v725_v12 = vpop.permute.xlu1 %724 }
  0x9c   : > { %v789_v14 = vsel %vm781_vm8, %v753_v11, %v725_v12  ;;  %v727_v16 = vpop.permute.xlu0 %726  ;;  %v620_v11 = vsel %vm3120_vm6, 0, %v593_v50 }
  0x9d   : > { %821 = vst.msk [vmem:[#allocation2 + $0x10] sm:$0xff] %vm818_vm9, %v789_v14  ;;  %v792_v57 = vsel %vm781_vm8, %v756_v54, %v727_v16 }
  0x9e   : > { %822 = vst.msk [vmem:[#allocation2 + $0x18] sm:$0xff] %vm818_vm9, %v792_v57 }
  0x9f   : > { %v693_v58 = vpop.permute.xlu1 %692 }
  0xa0   : > { %v3148_v18 = vld [vmem:[#allocation2 + $0x8] sm:$0xff]  ;;  %v695_v19 = vpop.permute.xlu0 %694  ;;  %v759_v21 = vsel %vm744_vm7, %v613_v17, %v693_v58 }
  0xa1   : > { %2513 = vmatprep.mubr.msk.bf16.mxu0 %vm818_vm9, %v3148_v18  ;;  %v762_v20 = vsel %vm744_vm7, %v614_v15, %v695_v19 }
  0xa3   : > { %v729_v22 = vpop.permute.xlu1 %728 }
  0xa4   : > { %v795_v61 = vsel %vm781_vm8, %v759_v21, %v729_v22  ;;  %v3162_v24 = vld [vmem:[#allocation2 + $0x10] sm:$0xff]  ;;  %v731_v25 = vpop.permute.xlu0 %730  ;;  %v3279_v21 = vld [vmem:[%s3568_s4] ss:$0 sm:$0xff] }
  0xa5   : > { %823 = vst.msk [vmem:[#allocation2 + $0x20] sm:$0xff] %vm818_vm9, %v795_v61  ;;  %2514 = vmatmul.mubr.msk.bf16.vlgmr.msra.gmra.mrb[0].mxu0 %vm818_vm9, %v3162_v24  ;;  %v798_v26 = vsel %vm781_vm8, %v762_v20, %v731_v25  ;;  %v3168_v27 = vld [vmem:[#allocation2 + $0x18] sm:$0xff] }
  0xa6   : > { %2534 = vmatpush3.bf16.msra.mxu0 %v1045_v23  ;;  %824 = vst.msk [vmem:[#allocation2 + $0x28] sm:$0xff] %vm818_vm9, %v798_v26  ;;  %2517 = vmatprep.mubr.msk.bf16.mxu0 %vm818_vm9, %v3168_v27 }
  0xa7   : > { %v697_v62 = vpop.permute.xlu1 %696  ;;  %2714 = vmatprep.subr.msk.bf16.mxu0 %vm892_vm3, %v3159_v0 }
  0xa8   : > { %v699_v33 = vpop.permute.xlu0 %698  ;;  %v765_v36 = vsel %vm744_vm7, %v615_v32, %v697_v62  ;;  %v1404_v62 = vstv %s1403_s18 }
  0xa9   : > { %v768_v34 = vsel %vm744_vm7, %v616_v30, %v699_v33  ;;  %vm1405_vm10 = vcmp.eq.s32.totalorder %v1404_v62, 1 }
  0xab   : > { %v733_v37 = vpop.permute.xlu1 %732 }
  0xac   : > { %v801_v38 = vsel %vm781_vm8, %v765_v36, %v733_v37  ;;  %v3184_v39 = vld [vmem:[#allocation2 + $0x20] sm:$0xff]  ;;  %v735_v40 = vpop.permute.xlu0 %734 }
  0xad   : > { %825 = vst.msk [vmem:[#allocation2 + $0x30] sm:$0xff] %vm818_vm9, %v801_v38  ;;  %2518 = vmatmul.mubr.msk.bf16.gmra.mrb[4].mxu0 %vm818_vm9, %v3184_v39  ;;  %v804_v8 = vsel %vm781_vm8, %v768_v34, %v735_v40  ;;  %v3190_v41 = vld [vmem:[#allocation2 + $0x28] sm:$0xff] }
  0xae   : > { %826 = vst.msk [vmem:[#allocation2 + $0x38] sm:$0xff] %vm818_vm9, %v804_v8  ;;  %2521 = vmatprep.mubr.msk.bf16.mxu0 %vm818_vm9, %v3190_v41 }
  0xaf   : > { %v701_v44 = vpop.permute.xlu1 %700 }
  0xb0   : > { %v685_v46 = vpop.permute.xlu0 %684  ;;  %v771_v49 = vsel %vm744_vm7, %v617_v45, %v701_v44 }
  0xb1   : > { %v747_v56 = vsel %vm744_vm7, %v609_v48, %v685_v46 }
  0xb3   : > { %v737_v51 = vpop.permute.xlu1 %736 }
  0xb4   : > { %v807_v53 = vsel %vm781_vm8, %v771_v49, %v737_v51  ;;  %v849_v55 = vld [vmem:[#allocation2 + $0x30] sm:$0xff]  ;;  %v703_v43 = vpop.permute.xlu0 %702 }
  0xb5   : > { %827 = vst.msk [vmem:[#allocation2 + $0x40] sm:$0xff] %vm818_vm9, %v807_v53  ;;  %2522 = vmatmul.mubr.msk.bf16.gmra.mrb[8].mxu0 %vm818_vm9, %v849_v55  ;;  %v850_v13 = vld [vmem:[#allocation2 + $0x38] sm:$0xff]  ;;  %v774_v3 = vsel %vm744_vm7, %v618_v31, %v703_v43 }
  0xb6   : > { %2525 = vmatprep.mubr.msk.bf16.mxu0 %vm818_vm9, %v850_v13 }
  0xb7   : > { %v721_v35 = vpop.permute.xlu1 %720 }
  0xb8   : > { %v783_v1 = vsel %vm781_vm8, %v747_v56, %v721_v35  ;;  %v705_v2 = vpop.permute.xlu0 %704 }
  0xb9   : > { %819 = vst.msk [vmem:[#allocation2] sm:$0xff] %vm818_vm9, %v783_v1  ;;  %v777_v5 = vsel %vm744_vm7, %v619_v63, %v705_v2 }
  0xbb   : > { %v739_v6 = vpop.permute.xlu1 %738 }
  0xbc   : > { %v851_v7 = vld [vmem:[#allocation2 + $0x40] sm:$0xff]  ;;  %v810_v59 = vsel %vm781_vm8, %v774_v3, %v739_v6  ;;  %v741_v9 = vpop.permute.xlu0 %740  ;;  %v2789_v6 = vld [vmem:[%s3569_s5 + $0x14] ss:$0 sps:$4 sm:$0xff]  }
  0xbd   : > { %2526 = vmatmul.mubr.msk.bf16.gmra.mrb[12].mxu0 %vm818_vm9, %v851_v7  ;;  %828 = vst.msk [vmem:[#allocation2 + $0x48] sm:$0xff] %vm818_vm9, %v810_v59  ;;  %v813_v10 = vsel %vm781_vm8, %v777_v5, %v741_v9 }
  0xbe   : > { %829 = vst.msk [vmem:[#allocation2 + $0x50] sm:$0xff] %vm818_vm9, %v813_v10 }
  0xbf   : > { %v707_v54 = vpop.permute.xlu1 %706 }
  0xc0   : > { %v831_v12 = vld [vmem:[#allocation2] sm:$0xff]  ;;  %v780_v42 = vsel %vm744_vm7, %v620_v11, %v707_v54 }
  0xc1   : > { %2535 = vmatprep.mubr.msk.bf16.mxu0 %vm818_vm9, %v831_v12 }
  0xc3   : > { %v743_v14 = vpop.permute.xlu1 %742 }
  0xc4   : > { %v852_v16 = vld [vmem:[#allocation2 + $0x48] sm:$0xff]  ;;  %v816_v57 = vsel %vm781_vm8, %v780_v42, %v743_v14 }
  0xc5   : > { %2536 = vmatmul.mubr.msk.bf16.vlgmr.msra.gmra.mrb[0].mxu0 %vm818_vm9, %v3148_v18  ;;  %2529 = vmatprep.mubr.msk.bf16.mxu1 %vm818_vm9, %v852_v16  ;;  %830 = vst.msk [vmem:[#allocation2 + $0x58] sm:$0xff] %vm818_vm9, %v816_v57  ;;  %v853_v58 = vld [vmem:[#allocation2 + $0x50] sm:$0xff] }
  0xc6   : > { %2556 = vmatpush3.bf16.msra.mxu0 %v1210_v47  ;;  %2539 = vmatprep.mubr.msk.bf16.mxu0 %vm818_vm9, %v3162_v24 }
  0xc7   : > { %2530 = vmatmul.mubr.msk.bf16.vlgmr.msra.gmra.mrb[0].mxu1 %vm818_vm9, %v853_v58 }
  0xcc   : > { %v1170_v15 = vld [vmem:[#allocation2 + $0x58] sm:$0xff] }
  0xcd   : > { %2540 = vmatmul.mubr.msk.bf16.gmra.mrb[4].mxu0 %vm818_vm9, %v3168_v27 }
  0xce   : > { %2543 = vmatprep.mubr.msk.bf16.mxu0 %vm818_vm9, %v3184_v39 }
  0xd5   : > { %2544 = vmatmul.mubr.msk.bf16.gmra.mrb[8].mxu0 %vm818_vm9, %v3190_v41 }
  0xd6   : > { %2547 = vmatprep.mubr.msk.bf16.mxu0 %vm818_vm9, %v849_v55 }
  0xdd   : > { %2548 = vmatmul.mubr.msk.bf16.gmra.mrb[12].mxu0 %vm818_vm9, %v850_v13 }
  0xde   : > { %2551 = vmatprep.mubr.msk.bf16.mxu0 %vm818_vm9, %v851_v7 }
  0xe5   : > { %2552 = vmatmul.mubr.msk.bf16.gmra.mrb[16].mxu0 %vm818_vm9, %v852_v16 }
  0xe6   : > { %2557 = vmatprep.mubr.msk.bf16.mxu0 %vm818_vm9, %v3162_v24 }
  0xed   : > { %2558 = vmatmul.mubr.msk.bf16.vlgmr.msra.gmra.mrb[0].mxu0 %vm818_vm9, %v3168_v27 }
  0xee   : > { %2561 = vmatprep.mubr.msk.bf16.mxu0 %vm818_vm9, %v3184_v39 }
  0xf5   : > { %2562 = vmatmul.mubr.msk.bf16.gmra.mrb[4].mxu0 %vm818_vm9, %v3190_v41 }
  0xf6   : > { %2565 = vmatprep.mubr.msk.bf16.mxu0 %vm818_vm9, %v849_v55  ;;  %v2788_v55 = vld [vmem:[%s3569_s5 + $0xc] sm:$0xff]  }
  0xf7   : > { %2577 = vmatprep.subr.bf16.mxu1 %v2788_v55 }
  0xf8   : > { %2578 = vmatpush3.bf16.msra.mxu1 %v2788_v55 }
  0xf9   : > { %2715 = vmatprep.subr.msk.bf16.mxu1 %vm1743_vm11, %v2789_v6 }
  0xfd   : > { %2566 = vmatmul.mubr.msk.bf16.gmra.mrb[8].mxu0 %vm818_vm9, %v850_v13 }
  0xfe   : > { %2569 = vmatprep.mubr.msk.bf16.mxu0 %vm818_vm9, %v851_v7 }
 0x105   : > { %2570 = vmatmul.mubr.msk.bf16.gmra.mrb[12].mxu0 %vm818_vm9, %v852_v16 }
 0x106   : > { %2573 = vmatprep.mubr.msk.bf16.mxu0 %vm818_vm9, %v853_v58 }
 0x10d   : > { %2574 = vmatmul.mubr.msk.bf16.gmra.mrb[16].mxu0 %vm818_vm9, %v1170_v15 }
 0x19a   : > { %v3267_v17 = vpop.f32.mrb[0].mxu1 }
 0x19b   : > { %v3269_v18 = vpop.f32.mrb[1].mxu1 }
 0x19c   : > { %v3271_v19 = vpop.f32.mrb[2].mxu1 }
 0x19d   : > { %v3273_v20 = vpop.f32.mrb[3].mxu1 }
 0x1c0   : > { %v2559_v22 = vpop.f32.mrb[0].mxu0 }
 0x1c1   : > { %v1354_v23 = vadd.f32 %v2559_v22, %v3279_v21  ;;  %v1246_v0 = vpop.f32.mrb[1].mxu0 }
 0x1c2   : > { %v1352_v61 = vadd.f32 %v3279_v21, %v1246_v0  ;;  %v2560_v24 = vpop.f32.mrb[2].mxu0 }
 0x1c3   : > { %v1355_v25 = vadd.f32 %v2560_v24, %v3279_v21  ;;  %v1249_v26 = vpop.f32.mrb[3].mxu0  ;;  %v1374_v30 = vmax.f32 %v1354_v23, 0.0 }
 0x1c4   : > { %v1353_v27 = vadd.f32 %v3279_v21, %v1249_v26  ;;  %v1372_v33 = vmax.f32 %v1352_v61, 0.0  ;;  %v1745_v26 = vsel %vm1743_vm11, %v2789_v6, 0 }
 0x1c5   : > { %v1375_v32 = vmax.f32 %v1355_v25, 0.0  ;;  %2580 = vmatpush3.bf16.msra.mxu1 %v1745_v26 }
 0x1c6   : > { %v1373_v34 = vmax.f32 %v1353_v27, 0.0 }
 0x1c7   : > { %v1393_v36 = vpack.c.bf16 %v1375_v32, %v1374_v30 }
 0x1c8   : > { %v1392_v37 = vpack.c.bf16 %v1373_v34, %v1372_v33  ;;  %v2563_v38 = vpop.f32.mrb[4].mxu0  ;;  %v3326_v33 = vld [vmem:[%s3569_s5] sm:$0xff]  }
 0x1c9   : > { %v1435_v39 = vshll.u32 %v1393_v36, 16  ;;  %v1358_v40 = vadd.f32 %v2563_v38, %v3279_v21  ;;  %1566 = vrot.lane.b32.xlu0 %v1393_v36, %s2835_s14  ;;  %v1262_v8 = vpop.f32.mrb[5].mxu0  ;;  %v1432_v41 = vshrl.u32 %v1393_v36, 16  ;;  %2597 = vmatprep.subr.bf16.mxu1 %v3326_v33 }
 0x1ca   : > { %v1356_v4 = vadd.f32 %v3279_v21, %v1262_v8  ;;  %v2564_v44 = vpop.f32.mrb[6].mxu0  ;;  %v3288_v45 = vsel %vm1405_vm10, 0, %v1392_v37 }
 0x1cb   : > { %v1359_v46 = vadd.f32 %v2564_v44, %v3279_v21  ;;  %v1265_v48 = vpop.f32.mrb[7].mxu0  ;;  %v1516_v49 = vrot.slane %v1435_v39, 1  ;;  %v1434_v51 = vrot.slane %v1432_v41, 7  ;;  %v1425_v53 = vshrl.u32 %v3288_v45, 16 }
 0x1cc   : > { %v1357_v52 = vadd.f32 %v3279_v21, %v1265_v48  ;;  %v1378_v43 = vmax.f32 %v1358_v40, 0.0  ;;  %v1376_v31 = vmax.f32 %v1356_v4, 0.0  ;;  %v1428_v1 = vshll.u32 %v3288_v45, 16 }
 0x1cd   : > { %v1379_v13 = vmax.f32 %v1359_v46, 0.0  ;;  %v1517_v56 = vor.u32 %v1516_v49, %v1432_v41  ;;  %v3296_v28 = vor.u32 %v1435_v39, %v1434_v51  ;;  %v1427_v63 = vrot.slane %v1425_v53, 7 }
 0x1ce   : > { %v1377_v35 = vmax.f32 %v1357_v52, 0.0 }
 0x1cf   : > { %v1395_v2 = vpack.c.bf16 %v1379_v13, %v1378_v43  ;;  %v1545_v3 = vsel %vm2975_vm2, %v1517_v56, 0  ;;  %v3309_v7 = vor.u32 %v1428_v1, %v1427_v63 }
 0x1d0   : > { %v1394_v5 = vpack.c.bf16 %v1377_v35, %v1376_v31  ;;  %1596 = vrot.lane.b32.xlu0 %v1545_v3, %s2836_s22  ;;  %v2567_v50 = vpop.f32.mrb[8].mxu0 }
 0x1d1   : > { %v1449_v59 = vshll.u32 %v1395_v2, 16  ;;  %v1362_v9 = vadd.f32 %v2567_v50, %v3279_v21  ;;  %v1278_v10 = vpop.f32.mrb[9].mxu0  ;;  %v1446_v11 = vshrl.u32 %v1395_v2, 16 }
 0x1d2   : > { %v1442_v54 = vshll.u32 %v1394_v5, 16  ;;  %v1360_v12 = vadd.f32 %v3279_v21, %v1278_v10  ;;  %1568 = vrot.lane.b32.xlu1 %v1394_v5, %s2835_s14  ;;  %v2568_v42 = vpop.f32.mrb[10].mxu0  ;;  %v1439_v47 = vshrl.u32 %v1394_v5, 16 }
 0x1d3   : > { %v1363_v14 = vadd.f32 %v2568_v42, %v3279_v21  ;;  %v1281_v16 = vpop.f32.mrb[11].mxu0  ;;  %v1520_v57 = vrot.slane %v1449_v59, 1  ;;  %v1448_v58 = vrot.slane %v1446_v11, 7  ;;  %v1382_v15 = vmax.f32 %v1362_v9, 0.0 }
 0x1d4   : > { %v1361_v22 = vadd.f32 %v3279_v21, %v1281_v16  ;;  %1570 = vrot.lane.b32.xlu0 %v1395_v2, %s2835_s14  ;;  %v1518_v23 = vrot.slane %v1442_v54, 1  ;;  %v1441_v0 = vrot.slane %v1439_v47, 7  ;;  %v1380_v27 = vmax.f32 %v1360_v12, 0.0 }
 0x1d5   : > { %v1383_v61 = vmax.f32 %v1363_v14, 0.0  ;;  %v1521_v24 = vor.u32 %v1520_v57, %v1446_v11  ;;  %v3318_v25 = vor.u32 %v1449_v59, %v1448_v58 }
 0x1d6   : > { %v1381_v62 = vmax.f32 %v1361_v22, 0.0  ;;  %v1519_v30 = vor.u32 %v1518_v23, %v1439_v47  ;;  %v3321_v32 = vor.u32 %v1442_v54, %v1441_v0 }
 0x1d7   : > { %v1397_v34 = vpack.c.bf16 %v1383_v61, %v1382_v15  ;;  %v1547_v36 = vsel %vm2975_vm2, %v1521_v24, 0  ;;  %v1507_v29 = vsel %vm3120_vm6, 0, %v3318_v25 }
 0x1d8   : > { %v1396_v37 = vpack.c.bf16 %v1381_v62, %v1380_v27  ;;  %1600 = vrot.lane.b32.xlu0 %v1547_v36, %s2836_s22  ;;  %v2571_v38 = vpop.f32.mrb[12].mxu0  ;;  %v1546_v39 = vsel %vm2975_vm2, %v1519_v30, 0  ;;  %v1408_v36 = vstv %s1407_s10 }
 0x1d9   : > { %v1463_v40 = vshll.u32 %v1397_v34, 16  ;;  %v1366_v8 = vadd.f32 %v2571_v38, %v3279_v21  ;;  %1598 = vrot.lane.b32.xlu1 %v1546_v39, %s2836_s22  ;;  %v1294_v41 = vpop.f32.mrb[13].mxu0  ;;  %v1460_v4 = vshrl.u32 %v1397_v34, 16  ;;  %vm1409_vm12 = vcmp.eq.s32.totalorder %v1408_v36, 1 }
 0x1da   : > { %v1456_v44 = vshll.u32 %v1396_v37, 16  ;;  %v1364_v46 = vadd.f32 %v3279_v21, %v1294_v41  ;;  %v2572_v48 = vpop.f32.mrb[14].mxu0  ;;  %v1453_v49 = vshrl.u32 %v1396_v37, 16 }
 0x1db   : > { %v1367_v51 = vadd.f32 %v2572_v48, %v3279_v21  ;;  %v1297_v52 = vpop.f32.mrb[15].mxu0  ;;  %v1524_v55 = vrot.slane %v1463_v40, 1  ;;  %v1462_v43 = vrot.slane %v1460_v4, 7  ;;  %v1386_v35 = vmax.f32 %v1366_v8, 0.0 }
 0x1dc   : > { %v1365_v13 = vadd.f32 %v3279_v21, %v1297_v52  ;;  %1574 = vrot.lane.b32.xlu0 %v1397_v34, %s2835_s14  ;;  %v1522_v56 = vrot.slane %v1456_v44, 1  ;;  %v1455_v31 = vrot.slane %v1453_v49, 7  ;;  %v1384_v5 = vmax.f32 %v1364_v46, 0.0 }
 0x1dd   : > { %v1387_v63 = vmax.f32 %v1367_v51, 0.0  ;;  %1572 = vrot.lane.b32.xlu1 %v1396_v37, %s2835_s14  ;;  %v1525_v2 = vor.u32 %v1524_v55, %v1460_v4  ;;  %v3342_v3 = vor.u32 %v1463_v40, %v1462_v43  ;;  %v1514_v55 = vrot.slane %v1428_v1, 1 }
 0x1de   : > { %v1385_v50 = vmax.f32 %v1365_v13, 0.0  ;;  %v1523_v6 = vor.u32 %v1522_v56, %v1453_v49  ;;  %v3344_v59 = vor.u32 %v1456_v44, %v1455_v31 }
 0x1df   : > { %v1399_v9 = vpack.c.bf16 %v1387_v63, %v1386_v35  ;;  %v1549_v10 = vsel %vm2975_vm2, %v1525_v2, 0 }
 0x1e0   : > { %v1398_v11 = vpack.c.bf16 %v1385_v50, %v1384_v5  ;;  %1604 = vrot.lane.b32.xlu0 %v1549_v10, %s2836_s22  ;;  %v2575_v54 = vpop.f32.mrb[16].mxu0  ;;  %v1548_v12 = vsel %vm2975_vm2, %v1523_v6, 0  ;;  %v1515_v50 = vor.u32 %v1514_v55, %v1425_v53 }
 0x1e1   : > { %v1477_v42 = vshll.u32 %v1399_v9, 16  ;;  %v2639_v47 = vadd.f32 %v2575_v54, %v3267_v17  ;;  %1602 = vrot.lane.b32.xlu1 %v1548_v12, %s2836_s22  ;;  %v1310_v14 = vpop.f32.mrb[17].mxu0  ;;  %v1474_v16 = vshrl.u32 %v1399_v9, 16 }
 0x1e2   : > { %v1470_v57 = vshll.u32 %v1398_v11, 16  ;;  %v2640_v58 = vadd.f32 %v1310_v14, %v3269_v18  ;;  %v2576_v15 = vpop.f32.mrb[18].mxu0  ;;  %v1467_v22 = vshrl.u32 %v1398_v11, 16  ;;  %v1544_v1 = vsel %vm2975_vm2, %v1515_v50, 0 }
 0x1e3   : > { %v1370_v23 = vadd.f32 %v2639_v47, %v3279_v21  ;;  %v2641_v0 = vadd.f32 %v2576_v15, %v3271_v19  ;;  %v1313_v61 = vpop.f32.mrb[19].mxu0  ;;  %v1528_v24 = vrot.slane %v1477_v42, 1  ;;  %v1476_v26 = vrot.slane %v1474_v16, 7 }
 0x1e4   : > { %v1368_v17 = vadd.f32 %v2640_v58, %v3279_v21  ;;  %v2642_v27 = vadd.f32 %v1313_v61, %v3273_v20  ;;  %1578 = vrot.lane.b32.xlu0 %v1399_v9, %s2835_s14  ;;  %v1526_v62 = vrot.slane %v1470_v57, 1  ;;  %v1469_v30 = vrot.slane %v1467_v22, 7 }
 0x1e5   : > { %v1371_v34 = vadd.f32 %v2641_v0, %v3279_v21  ;;  %1576 = vrot.lane.b32.xlu1 %v1398_v11, %s2835_s14  ;;  %v1529_v18 = vor.u32 %v1528_v24, %v1474_v16  ;;  %v3363_v37 = vor.u32 %v1477_v42, %v1476_v26  ;;  %v1390_v40 = vmax.f32 %v1370_v23, 0.0 }
 0x1e6   : > { %v1369_v19 = vadd.f32 %v2642_v27, %v3279_v21  ;;  %v1527_v38 = vor.u32 %v1526_v62, %v1467_v22  ;;  %v3366_v39 = vor.u32 %v1470_v57, %v1469_v30  ;;  %v1388_v41 = vmax.f32 %v1368_v17, 0.0  ;;  %v2791_v30 = vld [vmem:[%s3569_s5 + $0x8] ss:$0 sps:$4 sm:$0xff]  }
 0x1e7   : > { %v1391_v8 = vmax.f32 %v1371_v34, 0.0  ;;  %v1551_v20 = vsel %vm2975_vm2, %v1529_v18, 0  ;;  %v1506_v14 = vsel %vm3120_vm6, 0, %v3321_v32  ;;  %v1509_v0 = vsel %vm3120_vm6, 0, %v3342_v3 }
 0x1e8   : > { %v1389_v4 = vmax.f32 %v1369_v19, 0.0  ;;  %1608 = vrot.lane.b32.xlu0 %v1551_v20, %s2836_s22  ;;  %v1550_v44 = vsel %vm2975_vm2, %v1527_v38, 0  ;;  %v1508_v24 = vsel %vm3120_vm6, 0, %v3344_v59  ;;  %v1878_v19 = vsel %vm1743_vm11, %v2791_v30, 0  ;;  %v2792_v38 = vld [vmem:[%s3569_s5 + $0x18] sm:$0xff]  }
 0x1e9   : > { %1606 = vrot.lane.b32.xlu1 %v1550_v44, %s2836_s22  ;;  %v1401_v46 = vpack.c.bf16 %v1391_v8, %v1390_v40  ;;  %v1511_v40 = vsel %vm3120_vm6, 0, %v3363_v37  ;;  %v1510_v20 = vsel %vm3120_vm6, 0, %v3366_v39 }
 0x1ea   : > { %v1400_v21 = vpack.c.bf16 %v1389_v4, %v1388_v41 }
 0x1eb   : > { %v1423_v48 = vsel %vm1409_vm12, 0, %v1401_v46 }
 0x1ec   : > { %1564 = vrot.lane.b32.xlu0 %v3288_v45, %s2835_s14  ;;  %v1488_v49 = vshrl.u32 %v1423_v48, 16  ;;  %v1481_v51 = vshrl.u32 %v1400_v21, 16  ;;  %v1484_v52 = vshll.u32 %v1400_v21, 16  ;;  %v1491_v13 = vshll.u32 %v1423_v48, 16 }
 0x1ed   : > { %1580 = vrot.lane.b32.xlu1 %v1400_v21, %s2835_s14  ;;  %v1505_v45 = vsel %vm3120_vm6, 0, %v3296_v28 }
 0x1ee   : > { %v1490_v43 = vrot.slane %v1488_v49, 7  ;;  %v1530_v56 = vrot.slane %v1484_v52, 1  ;;  %v1483_v31 = vrot.slane %v1481_v51, 7  ;;  %v1532_v6 = vrot.slane %v1491_v13, 1 }
 0x1f0   : > { %1582 = vrot.lane.b32.xlu0 %v1423_v48, %s2835_s14  ;;  %v1531_v35 = vor.u32 %v1530_v56, %v1481_v51  ;;  %v3380_v63 = vor.u32 %v1484_v52, %v1483_v31  ;;  %v3382_v2 = vor.u32 %v1491_v13, %v1490_v43  ;;  %v1533_v9 = vor.u32 %v1532_v6, %v1488_v49 }
 0x1f1   : > { %v1504_v56 = vsel %vm3120_vm6, 0, %v3309_v7 }
 0x1f2   : > { %v1552_v5 = vsel %vm2975_vm2, %v1531_v35, 0  ;;  %v1553_v10 = vsel %vm2975_vm2, %v1533_v9, 0  ;;  %v1512_v49 = vsel %vm3120_vm6, 0, %v3380_v63  ;;  %v1513_v50 = vsel %vm3120_vm6, 0, %v3382_v2 }
 0x1f3   : > { %1610 = vrot.lane.b32.xlu1 %v1552_v5, %s2836_s22 }
 0x1f7   : > { %1594 = vrot.lane.b32.xlu1 %v1544_v1, %s2836_s22 }
 0x1fb   : > { %1612 = vrot.lane.b32.xlu1 %v1553_v10, %s2836_s22  ;;  %s3515_s22 = scalar_lea.vmem %s3571_s7, %s2355_s17 }
 0x23b   : > { %v1567_v11 = vpop.permute.xlu0 %1566 }
 0x23c   : > { %v1619_v53 = vsel %vm781_vm8, %v1505_v45, %v1567_v11  ;;  %v2793_v11 = vld [vmem:[%s3569_s5 + $0x20] ss:$0 sps:$4 sm:$0xff]  }
 0x23d   : > { %v2024_v60 = vsel %vm1743_vm11, %v2793_v11, 0  ;;  %v2439_v45 = vld [vmem:[%s3570_s6] ss:$0 sm:$0xff] }
 0x242   : > { %v1597_v54 = vpop.permute.xlu0 %1596 }
 0x243   : > { %v1649_v12 = vsel %vm1644_vm13, %v1619_v53, %v1597_v54 }
 0x244   : > { %1677 = vst.msk [vmem:[#allocation3 + $0x8] sm:$0xff] %vm1675_vm14, %v1649_v12  ;;  %v1569_v47 = vpop.permute.xlu1 %1568 }
 0x245   : > { %v1622_v57 = vsel %vm781_vm8, %v1506_v14, %v1569_v47 }
 0x246   : > { %v1571_v42 = vpop.permute.xlu0 %1570 }
 0x247   : > { %v1625_v28 = vsel %vm781_vm8, %v1507_v29, %v1571_v42 }
 0x24a   : > { %v1601_v16 = vpop.permute.xlu0 %1600 }
 0x24b   : > { %v1655_v58 = vsel %vm1644_vm13, %v1625_v28, %v1601_v16  ;;  %v1599_v15 = vpop.permute.xlu1 %1598  ;;  %v3410_v22 = vld [vmem:[#allocation3 + $0x8] sm:$0xff] }
 0x24c   : > { %1679 = vst.msk [vmem:[#allocation3 + $0x18] sm:$0xff] %vm1675_vm14, %v1655_v58  ;;  %v1652_v23 = vsel %vm1644_vm13, %v1622_v57, %v1599_v15  ;;  %2581 = vmatprep.mubr.msk.bf16.mxu1 %vm1675_vm14, %v3410_v22 }
 0x24d   : > { %1678 = vst.msk [vmem:[#allocation3 + $0x10] sm:$0xff] %vm1675_vm14, %v1652_v23 }
 0x24e   : > { %v1575_v25 = vpop.permute.xlu0 %1574 }
 0x24f   : > { %v1573_v32 = vpop.permute.xlu1 %1572  ;;  %v1631_v61 = vsel %vm781_vm8, %v1509_v0, %v1575_v25 }
 0x250   : > { %v1628_v17 = vsel %vm781_vm8, %v1508_v24, %v1573_v32 }
 0x252   : > { %v1605_v26 = vpop.permute.xlu0 %1604 }
 0x253   : > { %v1661_v27 = vsel %vm1644_vm13, %v1631_v61, %v1605_v26  ;;  %v1603_v62 = vpop.permute.xlu1 %1602  ;;  %v3436_v59 = vld [vmem:[#allocation3 + $0x18] sm:$0xff] }
 0x254   : > { %1681 = vst.msk [vmem:[#allocation3 + $0x28] sm:$0xff] %vm1675_vm14, %v1661_v27  ;;  %v1658_v3 = vsel %vm1644_vm13, %v1628_v17, %v1603_v62  ;;  %v3431_v34 = vld [vmem:[#allocation3 + $0x10] sm:$0xff] }
 0x255   : > { %1680 = vst.msk [vmem:[#allocation3 + $0x20] sm:$0xff] %vm1675_vm14, %v1658_v3  ;;  %2582 = vmatmul.mubr.msk.bf16.vlgmr.msra.gmra.mrb[4].mxu1 %vm1675_vm14, %v3431_v34 }
 0x256   : > { %2585 = vmatprep.mubr.msk.bf16.mxu1 %vm1675_vm14, %v3436_v59  ;;  %v1579_v18 = vpop.permute.xlu0 %1578  ;;  %2598 = vmatpush3.bf16.msra.mxu1 %v3326_v33 }
 0x257   : > { %v1577_v36 = vpop.permute.xlu1 %1576  ;;  %2716 = vmatprep.subr.msk.bf16.mxu1 %vm1743_vm11, %v2791_v30  ;;  %v1637_v8 = vsel %vm781_vm8, %v1511_v40, %v1579_v18 }
 0x258   : > { %v1634_v41 = vsel %vm781_vm8, %v1510_v20, %v1577_v36 }
 0x25a   : > { %v1609_v33 = vpop.permute.xlu0 %1608  ;;  %2600 = vmatpush3.bf16.msra.mxu1 %v1878_v19 }
 0x25b   : > { %v1667_v4 = vsel %vm1644_vm13, %v1637_v8, %v1609_v33  ;;  %v1607_v44 = vpop.permute.xlu1 %1606  ;;  %2617 = vmatprep.subr.bf16.mxu1 %v2792_v38  ;;  %v1702_v37 = vld [vmem:[#allocation3 + $0x28] sm:$0xff] }
 0x25c   : > { %1683 = vst.msk [vmem:[#allocation3 + $0x38] sm:$0xff] %vm1675_vm14, %v1667_v4  ;;  %v1664_v46 = vsel %vm1644_vm13, %v1634_v41, %v1607_v44  ;;  %v1701_v21 = vld [vmem:[#allocation3 + $0x20] sm:$0xff] }
 0x25d   : > { %1682 = vst.msk [vmem:[#allocation3 + $0x30] sm:$0xff] %vm1675_vm14, %v1664_v46  ;;  %2586 = vmatmul.mubr.msk.bf16.gmra.mrb[8].mxu1 %vm1675_vm14, %v1701_v21 }
 0x25e   : > { %2589 = vmatprep.mubr.msk.bf16.mxu1 %vm1675_vm14, %v1702_v37  ;;  %v1565_v48 = vpop.permute.xlu0 %1564 }
 0x25f   : > { %v1581_v39 = vpop.permute.xlu1 %1580  ;;  %v1616_v31 = vsel %vm781_vm8, %v1504_v56, %v1565_v48 }
 0x260   : > { %v1640_v52 = vsel %vm781_vm8, %v1512_v49, %v1581_v39 }
 0x262   : > { %v1583_v63 = vpop.permute.xlu0 %1582 }
 0x263   : > { %v1704_v43 = vld [vmem:[#allocation3 + $0x38] sm:$0xff]  ;;  %v1643_v6 = vsel %vm781_vm8, %v1513_v50, %v1583_v63 }
 0x264   : > { %v1703_v51 = vld [vmem:[#allocation3 + $0x30] sm:$0xff] }
 0x265   : > { %2590 = vmatmul.mubr.msk.bf16.gmra.mrb[12].mxu1 %vm1675_vm14, %v1703_v51  ;;  %v1611_v55 = vpop.permute.xlu1 %1610 }
 0x266   : > { %v1670_v13 = vsel %vm1644_vm13, %v1640_v52, %v1611_v55  ;;  %2593 = vmatprep.mubr.msk.bf16.mxu1 %vm1675_vm14, %v1704_v43 }
 0x267   : > { %1684 = vst.msk [vmem:[#allocation3 + $0x40] sm:$0xff] %vm1675_vm14, %v1670_v13 }
 0x269   : > { %v1595_v35 = vpop.permute.xlu1 %1594 }
 0x26a   : > { %v1646_v5 = vsel %vm1644_vm13, %v1616_v31, %v1595_v35 }
 0x26b   : > { %1676 = vst.msk [vmem:[#allocation3] sm:$0xff] %vm1675_vm14, %v1646_v5 }
 0x26d   : > { %v1613_v1 = vpop.permute.xlu1 %1612 }
 0x26e   : > { %v1673_v9 = vsel %vm1644_vm13, %v1643_v6, %v1613_v1  ;;  %v1705_v10 = vld [vmem:[#allocation3 + $0x40] sm:$0xff] }
 0x26f   : > { %1685 = vst.msk [vmem:[#allocation3 + $0x48] sm:$0xff] %vm1675_vm14, %v1673_v9  ;;  %2594 = vmatmul.mubr.msk.bf16.gmra.mrb[16].mxu1 %vm1675_vm14, %v1705_v10 }
 0x272   : > { %v1686_v7 = vld [vmem:[#allocation3] sm:$0xff] }
 0x273   : > { %2601 = vmatprep.mubr.msk.bf16.mxu1 %vm1675_vm14, %v1686_v7 }
 0x276   : > { %v1985_v2 = vld [vmem:[#allocation3 + $0x48] sm:$0xff] }
 0x277   : > { %2602 = vmatmul.mubr.msk.bf16.vlgmr.msra.gmra.mrb[4].mxu1 %vm1675_vm14, %v3410_v22 }
 0x278   : > { %2618 = vmatpush3.bf16.msra.mxu1 %v2792_v38  ;;  %2605 = vmatprep.mubr.msk.bf16.mxu1 %vm1675_vm14, %v3431_v34 }
 0x279   : > { %2717 = vmatprep.subr.msk.bf16.mxu1 %vm1743_vm11, %v2793_v11 }
 0x27c   : > { %2620 = vmatpush3.bf16.msra.mxu1 %v2024_v60 }
 0x27f   : > { %2606 = vmatmul.mubr.msk.bf16.gmra.mrb[8].mxu1 %vm1675_vm14, %v3436_v59 }
 0x280   : > { %2609 = vmatprep.mubr.msk.bf16.mxu1 %vm1675_vm14, %v1701_v21 }
 0x287   : > { %2610 = vmatmul.mubr.msk.bf16.gmra.mrb[12].mxu1 %vm1675_vm14, %v1702_v37 }
 0x288   : > { %2613 = vmatprep.mubr.msk.bf16.mxu1 %vm1675_vm14, %v1703_v51 }
 0x28f   : > { %2614 = vmatmul.mubr.msk.bf16.gmra.mrb[16].mxu1 %vm1675_vm14, %v1704_v43 }
 0x290   : > { %2621 = vmatprep.mubr.msk.bf16.mxu1 %vm1675_vm14, %v3431_v34 }
 0x297   : > { %2622 = vmatmul.mubr.msk.bf16.vlgmr.msra.gmra.mrb[4].mxu1 %vm1675_vm14, %v3436_v59 }
 0x298   : > { %2625 = vmatprep.mubr.msk.bf16.mxu1 %vm1675_vm14, %v1701_v21 }
 0x29f   : > { %2626 = vmatmul.mubr.msk.bf16.gmra.mrb[8].mxu1 %vm1675_vm14, %v1702_v37 }
 0x2a0   : > { %2629 = vmatprep.mubr.msk.bf16.mxu1 %vm1675_vm14, %v1703_v51 }
 0x2a7   : > { %2630 = vmatmul.mubr.msk.bf16.gmra.mrb[12].mxu1 %vm1675_vm14, %v1704_v43 }
 0x2a8   : > { %2633 = vmatprep.mubr.msk.bf16.mxu1 %vm1675_vm14, %v1705_v10 }
 0x2af   : > { %2634 = vmatmul.mubr.msk.bf16.gmra.mrb[16].mxu1 %vm1675_vm14, %v1985_v2 }
 0x36a   : > { %v2623_v53 = vpop.f32.mrb[4].mxu1 }
 0x36b   : > { %v2148_v54 = vadd.f32 %v2623_v53, %v2439_v45  ;;  %v2060_v12 = vpop.f32.mrb[5].mxu1 }
 0x36c   : > { %v2146_v42 = vadd.f32 %v2439_v45, %v2060_v12  ;;  %v2624_v47 = vpop.f32.mrb[6].mxu1 }
 0x36d   : > { %v2164_v29 = vmax.f32 %v2148_v54, 0.0  ;;  %v2149_v14 = vadd.f32 %v2624_v47, %v2439_v45  ;;  %v2063_v28 = vpop.f32.mrb[7].mxu1 }
 0x36e   : > { %v2162_v16 = vmax.f32 %v2146_v42, 0.0  ;;  %v2147_v57 = vadd.f32 %v2439_v45, %v2063_v28 }
 0x36f   : > { %2180 = vst.msk [vmem:[%s3515_s22 + $0x10] sm:$0xff] %vm781_vm8, %v2164_v29  ;;  %v2165_v58 = vmax.f32 %v2149_v14, 0.0 }
 0x370   : > { %2178 = vst.msk [vmem:[%s3515_s22] sm:$0xff] %vm781_vm8, %v2162_v16  ;;  %v2163_v15 = vmax.f32 %v2147_v57, 0.0 }
 0x371   : > { %2181 = vst.msk [vmem:[%s3515_s22 + $0x18] sm:$0xff] %vm781_vm8, %v2165_v58 }
 0x372   : > { %2179 = vst.msk [vmem:[%s3515_s22 + $0x8] sm:$0xff] %vm781_vm8, %v2163_v15  ;;  %v2627_v22 = vpop.f32.mrb[8].mxu1 }
 0x373   : > { %v2152_v23 = vadd.f32 %v2627_v22, %v2439_v45  ;;  %v2076_v25 = vpop.f32.mrb[9].mxu1 }
 0x374   : > { %v2150_v32 = vadd.f32 %v2439_v45, %v2076_v25  ;;  %v2628_v0 = vpop.f32.mrb[10].mxu1 }
 0x375   : > { %v2168_v61 = vmax.f32 %v2152_v23, 0.0  ;;  %v2153_v24 = vadd.f32 %v2628_v0, %v2439_v45  ;;  %v2079_v26 = vpop.f32.mrb[11].mxu1 }
 0x376   : > { %v2166_v17 = vmax.f32 %v2150_v32, 0.0  ;;  %v2151_v27 = vadd.f32 %v2439_v45, %v2079_v26 }
 0x377   : > { %2184 = vst.msk [vmem:[%s3515_s22 + $0x30] sm:$0xff] %vm781_vm8, %v2168_v61  ;;  %v2169_v62 = vmax.f32 %v2153_v24, 0.0 }
 0x378   : > { %2182 = vst.msk [vmem:[%s3515_s22 + $0x20] sm:$0xff] %vm781_vm8, %v2166_v17  ;;  %v2167_v30 = vmax.f32 %v2151_v27, 0.0 }
 0x379   : > { %2185 = vst.msk [vmem:[%s3515_s22 + $0x38] sm:$0xff] %vm781_vm8, %v2169_v62 }
 0x37a   : > { %2183 = vst.msk [vmem:[%s3515_s22 + $0x28] sm:$0xff] %vm781_vm8, %v2167_v30  ;;  %v2631_v3 = vpop.f32.mrb[12].mxu1 }
 0x37b   : > { %v2156_v34 = vadd.f32 %v2631_v3, %v2439_v45  ;;  %v2092_v59 = vpop.f32.mrb[13].mxu1 }
 0x37c   : > { %v2154_v18 = vadd.f32 %v2439_v45, %v2092_v59  ;;  %v2632_v36 = vpop.f32.mrb[14].mxu1 }
 0x37d   : > { %v2172_v19 = vmax.f32 %v2156_v34, 0.0  ;;  %v2157_v38 = vadd.f32 %v2632_v36, %v2439_v45  ;;  %v2095_v40 = vpop.f32.mrb[15].mxu1 }
 0x37e   : > { %v2170_v8 = vmax.f32 %v2154_v18, 0.0  ;;  %v2155_v20 = vadd.f32 %v2439_v45, %v2095_v40 }
 0x37f   : > { %2188 = vst.msk [vmem:[%s3515_s22 + $0x50] sm:$0xff] %vm781_vm8, %v2172_v19  ;;  %v2173_v33 = vmax.f32 %v2157_v38, 0.0 }
 0x380   : > { %2186 = vst.msk [vmem:[%s3515_s22 + $0x40] sm:$0xff] %vm781_vm8, %v2170_v8  ;;  %v2171_v41 = vmax.f32 %v2155_v20, 0.0 }
 0x381   : > { %2189 = vst.msk [vmem:[%s3515_s22 + $0x58] sm:$0xff] %vm781_vm8, %v2173_v33 }
 0x382   : > { %2187 = vst.msk [vmem:[%s3515_s22 + $0x48] sm:$0xff] %vm781_vm8, %v2171_v41  ;;  %v2635_v4 = vpop.f32.mrb[16].mxu1 }
 0x383   : > { %v2160_v44 = vadd.f32 %v2635_v4, %v2439_v45  ;;  %v2108_v46 = vpop.f32.mrb[17].mxu1 }
 0x384   : > { %v2158_v21 = vadd.f32 %v2439_v45, %v2108_v46  ;;  %v2636_v37 = vpop.f32.mrb[18].mxu1 }
 0x385   : > { %v2176_v39 = vmax.f32 %v2160_v44, 0.0  ;;  %v2161_v48 = vadd.f32 %v2636_v37, %v2439_v45  ;;  %v2111_v49 = vpop.f32.mrb[19].mxu1 }
 0x386   : > { %v2174_v51 = vmax.f32 %v2158_v21, 0.0  ;;  %v2159_v52 = vadd.f32 %v2439_v45, %v2111_v49 }
 0x387   : > { %2192 = vst.msk [vmem:[%s3515_s22 + $0x70] sm:$0xff] %vm781_vm8, %v2176_v39  ;;  %v2177_v55 = vmax.f32 %v2161_v48, 0.0 }
 0x388   : > { %2190 = vst.msk [vmem:[%s3515_s22 + $0x60] sm:$0xff] %vm781_vm8, %v2174_v51  ;;  %v2175_v43 = vmax.f32 %v2159_v52, 0.0 }
 0x389   : > { %2193 = vst.msk [vmem:[%s3515_s22 + $0x78] sm:$0xff] %vm781_vm8, %v2177_v55 }
 0x38a   : > { %2191 = vst.msk [vmem:[%s3515_s22 + $0x68] sm:$0xff] %vm781_vm8, %v2175_v43 }
 0x38b PF: > { %s17_s28 = sadd.s32 1, %s2832_s28   ;;  %s3577_s24 = smov %s2824_s26 }
 0x38c   : > { %p14_p1 = scmp.ge.s32.totalorder %s17_s28, 6   ;;  %s3578_s25 = smov %s2828_s27 }
 0x38d   : > { %s3579_s26 = smov %s3582_s29  ;;  %s3580_s27 = smov %s3586_s30 }
 0x38e   :  { %16 = sbr.rel (!%p14_p1) target bundleno = 3 (0x3), region = 92 }

</bundles_post_ra>
